<compile_context>
chip_gen: v6e
topology: v6e:2x2x1
jax: 0.10.0
libtpu: 0.0.40
codegen_flags: <defaults>
</compile_context>

<pallas_src>
import functools

import jax
import jax.numpy as jnp
from jax.experimental import pallas as pl
from jax.experimental.pallas import tpu as pltpu

F1 = 32
F2 = 32
OUT_SZ = 20
K = 3
EPS = 1e-5
NEG_SLOPE = 0.01                 # PyTorch LeakyReLU default
TM_CAP = 4096                    # big tiles amortize per-step overhead; ~2.5 MiB/buf worst case
VMEM_LIMIT = 32 * 1024 * 1024    # safe scoped-VMEM request on v5e / v6e / v7x


def _round_up(x, m):
    return ((x + m - 1) // m) * m


def _choose_tm(M):
    """Row-tile: big enough to amortize ~0.35us/step overhead, but >=2 grid
    steps when M allows so dimension_semantics=('parallel',) engages both v7x
    TensorCores.  Always a multiple of 16 (bf16 sublane packing)."""
    if M <= 512:
        return _round_up(M, 16)
    return min(TM_CAP, _round_up(pl.cdiv(M, 2), 256))


def _apply_act(y, act):
    if act == "leaky":
        return jnp.where(y >= 0.0, y, NEG_SLOPE * y)
    if act == "tanh":
        return jnp.tanh(y)
    if act == "sigmoid":
        # exact sigmoid (exp on the EUP slot); stays in [0, 1]
        return 1.0 / (1.0 + jnp.exp(-y))
    return y


# ----------------------------------------------------------------------------
# Kernel 1: M-gridded fused matmul + shift + activation (BN scale pre-folded
# into the weights by the caller; bf16 operands, f32 epilogue).
# Used for both encoder convs (im2col) and phase-packed conv-transposes.
# ----------------------------------------------------------------------------
def _matmul_act_kernel(x_ref, w_ref, b_ref, o_ref, *, act):
    y = jnp.dot(x_ref[...], w_ref[...], preferred_element_type=jnp.float32)
    y = _apply_act(y + b_ref[...], act)
    o_ref[...] = y.astype(o_ref.dtype)


def fused_matmul_act(x, w, shift, act, out_dtype=jnp.bfloat16):
    """act((M,K) @ (K,N) + shift) -> (M,N), row-gridded, no XLA-side padding."""
    M, Kd = x.shape
    Kw, N = w.shape
    assert Kd == Kw
    tm = _choose_tm(M)
    xb = x.astype(jnp.bfloat16)              # no-op when caller already passes bf16
    wb = w.astype(jnp.bfloat16)
    sb = shift.reshape(1, N).astype(jnp.float32)
    out_isz = jnp.dtype(out_dtype).itemsize
    cost = pl.CostEstimate(
        flops=2 * M * Kd * N,
        transcendentals=(M * N if act in ("tanh", "sigmoid") else 0),
        bytes_accessed=M * Kd * 2 + Kd * N * 2 + N * 4 + M * N * out_isz)
    return pl.pallas_call(
        functools.partial(_matmul_act_kernel, act=act),
        out_shape=jax.ShapeDtypeStruct((M, N), out_dtype),
        grid=(pl.cdiv(M, tm),),
        in_specs=[
            pl.BlockSpec((tm, Kd), lambda i: (i, 0)),
            pl.BlockSpec((Kw, N), lambda i: (0, 0)),
            pl.BlockSpec((1, N), lambda i: (0, 0)),
        ],
        out_specs=pl.BlockSpec((tm, N), lambda i: (i, 0)),
        compiler_params=pltpu.CompilerParams(
            dimension_semantics=("parallel",),
            vmem_limit_bytes=VMEM_LIMIT),
        cost_estimate=cost,
    )(xb, wb, sb)


# ----------------------------------------------------------------------------
# Kernel 2: fused encoder-Linear(tanh) + decoder-Linear(leaky), gridded over
# the feat columns of W2.  h / W1 / b1 stay VMEM-resident across the grid; the
# 20-wide latent z never touches HBM (recomputed per step: trivially cheap and
# keeps every grid step independent, so "parallel" is safe on v7x megacore).
# ----------------------------------------------------------------------------
def _linear_pair_kernel(h_ref, w1_ref, b1_ref, w2_ref, b2_ref, o_ref):
    z = jnp.tanh(jnp.dot(h_ref[...], w1_ref[...],
                         preferred_element_type=jnp.float32) + b1_ref[...])
    d = jnp.dot(z.astype(jnp.bfloat16), w2_ref[...],
                preferred_element_type=jnp.float32) + b2_ref[...]
    o_ref[...] = jnp.where(d >= 0.0, d, NEG_SLOPE * d).astype(o_ref.dtype)


def fused_linear_pair(h, w1, b1, w2, b2, out_dtype=jnp.bfloat16):
    B, feat = h.shape
    out_sz = w1.shape[1]
    # column tile for the decoder output: lane-dense (multiple of 128) when
    # possible, aiming for >=2 grid steps; otherwise one full-width block.
    tn = feat
    for cand in (512, 256, 128):
        if feat % cand == 0 and feat // cand >= 2:
            tn = cand
            break
    steps = feat // tn
    out_isz = jnp.dtype(out_dtype).itemsize
    cost = pl.CostEstimate(
        flops=2 * B * feat * out_sz * (steps + 1),
        transcendentals=B * out_sz * steps,
        bytes_accessed=(B * feat + feat * out_sz + out_sz * feat) * 2
                       + (out_sz + feat) * 4 + B * feat * out_isz)
    return pl.pallas_call(
        _linear_pair_kernel,
        out_shape=jax.ShapeDtypeStruct((B, feat), out_dtype),
        grid=(steps,),
        in_specs=[
            pl.BlockSpec((B, feat), lambda j: (0, 0)),       # h      (resident)
            pl.BlockSpec((feat, out_sz), lambda j: (0, 0)),  # W1     (resident)
            pl.BlockSpec((1, out_sz), lambda j: (0, 0)),     # b1     (resident)
            pl.BlockSpec((out_sz, tn), lambda j: (0, j)),    # W2     (streamed)
            pl.BlockSpec((1, tn), lambda j: (0, j)),         # b2     (streamed)
        ],
        out_specs=pl.BlockSpec((B, tn), lambda j: (0, j)),
        compiler_params=pltpu.CompilerParams(
            dimension_semantics=("parallel",),
            vmem_limit_bytes=VMEM_LIMIT),
        cost_estimate=cost,
    )(h.astype(jnp.bfloat16), w1.astype(jnp.bfloat16),
      b1.reshape(1, -1).astype(jnp.float32),
      w2.astype(jnp.bfloat16), b2.reshape(1, -1).astype(jnp.float32))


# ----------------------------------------------------------------------------
# Glue: im2col, weight flattening, BN folding, conv-transpose phase packing
# (plain JAX / XLA data plumbing).
# ----------------------------------------------------------------------------
def _im2col_s2(x_pad, OH, OW):
    """(N, Hp, Wp, C) bf16 -> (N*OH*OW, 9*C); patch column order (ky, kx, ci)."""
    N, _, _, C = x_pad.shape
    cols = []
    for ky in range(K):
        for kx in range(K):
            cols.append(x_pad[:, ky::2, kx::2, :][:, :OH, :OW, :])
    p = jnp.stack(cols, axis=3)                  # (N, OH, OW, 9, C)
    return p.reshape(N * OH * OW, K * K * C)


def _conv_w_flat(w):
    # PyTorch Conv2d weight (Cout, Cin, kh, kw) -> (kh*kw*Cin, Cout), order (ky, kx, ci)
    return jnp.transpose(w, (2, 3, 1, 0)).reshape(K * K * w.shape[1], w.shape[0])


def _bn_fold(gamma, beta, rmean, rvar, conv_bias):
    scale = gamma / jnp.sqrt(rvar + EPS)
    shift = beta + (conv_bias - rmean) * scale
    return scale, shift


def _conv2d_s2(x_nhwc, w, scale, shift, act, out_dtype):
    """Conv2d(k=3, s=2, p=1) + folded-BN + activation."""
    N, H, W, _ = x_nhwc.shape
    OH, OW = H // 2, W // 2
    xb = x_nhwc.astype(jnp.bfloat16)             # cast BEFORE im2col: halves patch bytes
    xp = jnp.pad(xb, ((0, 0), (1, 1), (1, 1), (0, 0)))
    patches = _im2col_s2(xp, OH, OW)
    w_scaled = _conv_w_flat(w) * scale[None, :]  # fold BN scale into weights
    y = fused_matmul_act(patches, w_scaled, shift, act, out_dtype)
    return y.reshape(N, OH, OW, w.shape[0])


def _shift_right_col(x):   # x[i, j+1] with zero fill past the right edge
    return jnp.pad(x[:, :, 1:, :], ((0, 0), (0, 0), (0, 1), (0, 0)))


def _shift_down_row(x):    # x[i+1, j] with zero fill past the bottom edge
    return jnp.pad(x[:, 1:, :, :], ((0, 0), (0, 1), (0, 0), (0, 0)))


def _convT_weight_packed(w):
    """ConvTranspose2d weight (Cin, Cout, 3, 3) -> zero-structured (4*Cin, 4*Cout).

    Input row layout  : [x00 | x01 | x10 | x11]            (x01=x[i,j+1], x10=x[i+1,j])
    Output col layout : [p(0,0) | p(0,1) | p(1,0) | p(1,1)] sub-pixel phases (dy, dx)
      p(0,0) = x00*w[1,1]
      p(0,1) = x00*w[1,2] + x01*w[1,0]
      p(1,0) = x00*w[2,1] + x10*w[0,1]
      p(1,1) = x00*w[2,2] + x01*w[2,0] + x10*w[0,2] + x11*w[0,0]
    """
    Cin, Cout = w.shape[0], w.shape[1]
    t = lambda ky, kx: w[:, :, ky, kx]           # (Cin, Cout)
    z = jnp.zeros((Cin, Cout), w.dtype)
    col00 = jnp.concatenate([t(1, 1), z,       z,       z      ], axis=0)
    col01 = jnp.concatenate([t(1, 2), t(1, 0), z,       z      ], axis=0)
    col10 = jnp.concatenate([t(2, 1), z,       t(0, 1), z      ], axis=0)
    col11 = jnp.concatenate([t(2, 2), t(2, 0), t(0, 2), t(0, 0)], axis=0)
    return jnp.concatenate([col00, col01, col10, col11], axis=1)   # (4Cin, 4Cout)


def _convT2d_s2(x_nhwc, w, scale, shift, act, out_dtype):
    """ConvTranspose2d(k=3, s=2, p=1, output_padding=1) + folded-BN + activation.
    One lane-dense matmul: de-duplicated [x00|x01|x10|x11] input (4*Cin cols)
    against a zero-structured (4*Cin, 4*Cout) weight; all 4 sub-pixel phases
    land in ONE packed (tm, 4*Cout) store (128 lanes for Cout=32)."""
    N, H, W, Cin = x_nhwc.shape
    Cout = w.shape[1]
    xb = x_nhwc.astype(jnp.bfloat16)
    x01 = _shift_right_col(xb)
    x10 = _shift_down_row(xb)
    x11 = _shift_right_col(x10)
    x_cat = jnp.concatenate([xb, x01, x10, x11], axis=-1).reshape(N * H * W, 4 * Cin)
    wp = _convT_weight_packed(w) * jnp.tile(scale, 4)[None, :]     # fold BN scale
    shift4 = jnp.tile(shift, 4)
    y = fused_matmul_act(x_cat, wp, shift4, act, out_dtype)        # (M, 4*Cout)
    y = y.reshape(N, H, W, 2, 2, Cout)                             # (..., dy, dx, c)
    y = jnp.transpose(y, (0, 1, 3, 2, 4, 5)).reshape(N, 2 * H, 2 * W, Cout)
    return y


# ----------------------------------------------------------------------------
# Parameters (deterministic, shapes mirror the PyTorch module)
# ----------------------------------------------------------------------------
def init_params(key, H, W):
    feat = F2 * (H // 4) * (W // 4)
    keys = iter(jax.random.split(key, 40))

    def nrm(shape, s=0.1):
        return s * jax.random.normal(next(keys), shape, jnp.float32)

    def bn(c):
        return dict(
            gamma=1.0 + nrm((c,)),
            beta=nrm((c,)),
            rmean=nrm((c,)),
            rvar=jax.random.uniform(next(keys), (c,), jnp.float32, 0.5, 1.5),
        )

    p = {}
    p["conv1_w"] = nrm((F1, 1, K, K)); p["conv1_b"] = nrm((F1,)); p["bn1"] = bn(F1)
    p["conv2_w"] = nrm((F2, F1, K, K)); p["conv2_b"] = nrm((F2,)); p["bn2"] = bn(F2)
    p["lin_enc_w"] = nrm((OUT_SZ, feat)); p["lin_enc_b"] = nrm((OUT_SZ,)); p["bn3"] = bn(OUT_SZ)
    p["lin_dec_w"] = nrm((feat, OUT_SZ)); p["lin_dec_b"] = nrm((feat,)); p["bn4"] = bn(feat)
    p["convt1_w"] = nrm((F2, F1, K, K)); p["convt1_b"] = nrm((F1,)); p["bn5"] = bn(F1)  # (Cin, Cout, kh, kw)
    p["convt2_w"] = nrm((F1, 1, K, K)); p["convt2_b"] = nrm((1,))
    return p


# ----------------------------------------------------------------------------
# Full forward (matches TinyAutoencoder.forward semantics, NCHW in/out)
# ----------------------------------------------------------------------------
def tiny_autoencoder_forward(p, x_nchw):
    N, _, H, W = x_nchw.shape
    feat = F2 * (H // 4) * (W // 4)
    x = jnp.transpose(x_nchw, (0, 2, 3, 1))                        # -> NHWC

    # ---- encoder convs (bf16 intermediates) ----
    s, b = _bn_fold(**p["bn1"], conv_bias=p["conv1_b"])
    h = _conv2d_s2(x, p["conv1_w"], s, b, "leaky", jnp.bfloat16)   # (N, H/2, W/2, 32)
    s, b = _bn_fold(**p["bn2"], conv_bias=p["conv2_b"])
    h = _conv2d_s2(h, p["conv2_w"], s, b, "leaky", jnp.bfloat16)   # (N, H/4, W/4, 32)
    h_flat = jnp.transpose(h, (0, 3, 1, 2)).reshape(N, feat)       # PyTorch NCHW flatten order

    # ---- fused linear encoder head + decoder head ----
    s3, b3 = _bn_fold(**p["bn3"], conv_bias=p["lin_enc_b"])
    s4, b4 = _bn_fold(**p["bn4"], conv_bias=p["lin_dec_b"])
    w1 = p["lin_enc_w"].T * s3[None, :]                            # fold BN scale into weights
    w2 = p["lin_dec_w"].T * s4[None, :]
    d = fused_linear_pair(h_flat, w1, b3, w2, b4, jnp.bfloat16)    # (N, feat)

    # ---- decoder conv-transposes ----
    d = d.reshape(N, F2, H // 4, W // 4)                           # Unflatten (NCHW)
    d = jnp.transpose(d, (0, 2, 3, 1))                             # -> NHWC
    s5, b5 = _bn_fold(**p["bn5"], conv_bias=p["convt1_b"])
    d = _convT2d_s2(d, p["convt1_w"], s5, b5, "leaky", jnp.bfloat16)          # (N, H/2, W/2, 32)
    ones = jnp.ones((1,), jnp.float32)
    d = _convT2d_s2(d, p["convt2_w"], ones, p["convt2_b"], "sigmoid", jnp.float32)  # (N, H, W, 1)
    return jnp.transpose(d, (0, 3, 1, 2))                          # -> NCHW


if __name__ == "__main__":
    B, H, W = 2, 16, 16
    key = jax.random.PRNGKey(0)
    kx, kp = jax.random.split(key)
    x = jax.random.normal(kx, (B, 1, H, W), jnp.float32)
    params = init_params(kp, H, W)

    out = jax.jit(tiny_autoencoder_forward)(params, x)
    jax.block_until_ready(out)

    assert out.shape == (B, 1, H, W), out.shape
    assert out.dtype == jnp.float32
    assert bool(jnp.all(jnp.isfinite(out)))
    assert bool(jnp.all((out >= 0.0) & (out <= 1.0)))  # sigmoid output range
    print("KERNEL_OK")
</pallas_src>

<mosaic_0001>
module attributes {stable_mosaic.version = 11 : i64} {
  func.func @_matmul_act_kernel(%arg0: i32, %arg1: memref<128x9xbf16, #tpu.memory_space<vmem>>, %arg2: memref<9x32xbf16, #tpu.memory_space<vmem>>, %arg3: memref<1x32xf32, #tpu.memory_space<vmem>>, %arg4: memref<128x32xbf16, #tpu.memory_space<vmem>>) attributes {dimension_semantics = [#tpu.dimension_semantics<parallel>], iteration_bounds = array<i64: 1>, scalar_prefetch = 0 : i64, scratch_operands = 0 : i64, tpu.core_type = #tpu.core_type<tc>, window_params = [{transform_indices = @transform_0, window_bounds = array<i64: 128, 9>}, {pipeline_mode = #tpu.pipeline_mode<synchronous>, transform_indices = @transform_1, window_bounds = array<i64: 9, 32>}, {pipeline_mode = #tpu.pipeline_mode<synchronous>, transform_indices = @transform_2, window_bounds = array<i64: 1, 32>}, {transform_indices = @transform_3, window_bounds = array<i64: 128, 32>}]} {
    %c0 = arith.constant 0 : index
    %c0_0 = arith.constant 0 : index
    %0 = vector.load %arg1[%c0, %c0_0] : memref<128x9xbf16, #tpu.memory_space<vmem>>, vector<128x9xbf16>
    %c0_1 = arith.constant 0 : index
    %c0_2 = arith.constant 0 : index
    %1 = vector.load %arg2[%c0_1, %c0_2] : memref<9x32xbf16, #tpu.memory_space<vmem>>, vector<9x32xbf16>
    %cst = arith.constant dense<0.000000e+00> : vector<128x32xf32>
    %2 = tpu.matmul %0, %1, %cst {dimension_numbers = #tpu.dot_dimension_numbers<[1], [0], [0], [1], [0, 0, 1, 1], [], []>} : vector<128x9xbf16>, vector<9x32xbf16>, vector<128x32xf32> -> vector<128x32xf32>
    %c0_3 = arith.constant 0 : index
    %c0_4 = arith.constant 0 : index
    %3 = vector.load %arg3[%c0_3, %c0_4] : memref<1x32xf32, #tpu.memory_space<vmem>>, vector<1x32xf32>
    %4 = vector.broadcast %3 : vector<1x32xf32> to vector<128x32xf32>
    %5 = arith.addf %2, %4 : vector<128x32xf32>
    %cst_5 = arith.constant 0.000000e+00 : f32
    %6 = vector.broadcast %cst_5 : f32 to vector<128x32xf32>
    %7 = arith.cmpf oge, %5, %6 : vector<128x32xf32>
    %cst_6 = arith.constant 0.00999999977 : f32
    %8 = vector.broadcast %cst_6 : f32 to vector<128x32xf32>
    %9 = arith.mulf %8, %5 : vector<128x32xf32>
    %10 = arith.select %7, %5, %9 : vector<128x32xi1>, vector<128x32xf32>
    %11 = arith.truncf %10 : vector<128x32xf32> to vector<128x32xbf16>
    %c0_7 = arith.constant 0 : index
    %c0_8 = arith.constant 0 : index
    %12 = vector.load %arg4[%c0_7, %c0_8] : memref<128x32xbf16, #tpu.memory_space<vmem>>, vector<128x32xbf16>
    tpu.vector_store %arg4[%c0_7, %c0_8], %11 {strides = array<i32>} : memref<128x32xbf16, #tpu.memory_space<vmem>>, vector<128x32xbf16>,
    return
  }
  func.func @transform_0(%arg0: i32) -> (i32, i32) {
    %c0_i32 = arith.constant 0 : i32
    %c0_i32_0 = arith.constant 0 : i32
    return %arg0, %c0_i32 : i32, i32
  }
  func.func @transform_1(%arg0: i32) -> (i32, i32) {
    %c0_i32 = arith.constant 0 : i32
    %c0_i32_0 = arith.constant 0 : i32
    %c0_i32_1 = arith.constant 0 : i32
    return %c0_i32, %c0_i32_0 : i32, i32
  }
  func.func @transform_2(%arg0: i32) -> (i32, i32) {
    %c0_i32 = arith.constant 0 : i32
    %c0_i32_0 = arith.constant 0 : i32
    %c0_i32_1 = arith.constant 0 : i32
    return %c0_i32, %c0_i32_0 : i32, i32
  }
  func.func @transform_3(%arg0: i32) -> (i32, i32) {
    %c0_i32 = arith.constant 0 : i32
    %c0_i32_0 = arith.constant 0 : i32
    return %arg0, %c0_i32 : i32, i32
  }
}

module attributes {stable_mosaic.version = 11 : i64} {
  func.func @_matmul_act_kernel(%arg0: i32, %arg1: memref<32x288xbf16, #tpu.memory_space<vmem>>, %arg2: memref<288x32xbf16, #tpu.memory_space<vmem>>, %arg3: memref<1x32xf32, #tpu.memory_space<vmem>>, %arg4: memref<32x32xbf16, #tpu.memory_space<vmem>>) attributes {dimension_semantics = [#tpu.dimension_semantics<parallel>], iteration_bounds = array<i64: 1>, scalar_prefetch = 0 : i64, scratch_operands = 0 : i64, tpu.core_type = #tpu.core_type<tc>, window_params = [{transform_indices = @transform_0, window_bounds = array<i64: 32, 288>}, {pipeline_mode = #tpu.pipeline_mode<synchronous>, transform_indices = @transform_1, window_bounds = array<i64: 288, 32>}, {pipeline_mode = #tpu.pipeline_mode<synchronous>, transform_indices = @transform_2, window_bounds = array<i64: 1, 32>}, {transform_indices = @transform_3, window_bounds = array<i64: 32, 32>}]} {
    %c0 = arith.constant 0 : index
    %c0_0 = arith.constant 0 : index
    %0 = vector.load %arg1[%c0, %c0_0] : memref<32x288xbf16, #tpu.memory_space<vmem>>, vector<32x288xbf16>
    %c0_1 = arith.constant 0 : index
    %c0_2 = arith.constant 0 : index
    %1 = vector.load %arg2[%c0_1, %c0_2] : memref<288x32xbf16, #tpu.memory_space<vmem>>, vector<288x32xbf16>
    %cst = arith.constant dense<0.000000e+00> : vector<32x32xf32>
    %2 = tpu.matmul %0, %1, %cst {dimension_numbers = #tpu.dot_dimension_numbers<[1], [0], [0], [1], [0, 0, 1, 1], [], []>} : vector<32x288xbf16>, vector<288x32xbf16>, vector<32x32xf32> -> vector<32x32xf32>
    %c0_3 = arith.constant 0 : index
    %c0_4 = arith.constant 0 : index
    %3 = vector.load %arg3[%c0_3, %c0_4] : memref<1x32xf32, #tpu.memory_space<vmem>>, vector<1x32xf32>
    %4 = vector.broadcast %3 : vector<1x32xf32> to vector<32x32xf32>
    %5 = arith.addf %2, %4 : vector<32x32xf32>
    %cst_5 = arith.constant 0.000000e+00 : f32
    %6 = vector.broadcast %cst_5 : f32 to vector<32x32xf32>
    %7 = arith.cmpf oge, %5, %6 : vector<32x32xf32>
    %cst_6 = arith.constant 0.00999999977 : f32
    %8 = vector.broadcast %cst_6 : f32 to vector<32x32xf32>
    %9 = arith.mulf %8, %5 : vector<32x32xf32>
    %10 = arith.select %7, %5, %9 : vector<32x32xi1>, vector<32x32xf32>
    %11 = arith.truncf %10 : vector<32x32xf32> to vector<32x32xbf16>
    %c0_7 = arith.constant 0 : index
    %c0_8 = arith.constant 0 : index
    %12 = vector.load %arg4[%c0_7, %c0_8] : memref<32x32xbf16, #tpu.memory_space<vmem>>, vector<32x32xbf16>
    tpu.vector_store %arg4[%c0_7, %c0_8], %11 {strides = array<i32>} : memref<32x32xbf16, #tpu.memory_space<vmem>>, vector<32x32xbf16>,
    return
  }
  func.func @transform_0(%arg0: i32) -> (i32, i32) {
    %c0_i32 = arith.constant 0 : i32
    %c0_i32_0 = arith.constant 0 : i32
    return %arg0, %c0_i32 : i32, i32
  }
  func.func @transform_1(%arg0: i32) -> (i32, i32) {
    %c0_i32 = arith.constant 0 : i32
    %c0_i32_0 = arith.constant 0 : i32
    %c0_i32_1 = arith.constant 0 : i32
    return %c0_i32, %c0_i32_0 : i32, i32
  }
  func.func @transform_2(%arg0: i32) -> (i32, i32) {
    %c0_i32 = arith.constant 0 : i32
    %c0_i32_0 = arith.constant 0 : i32
    %c0_i32_1 = arith.constant 0 : i32
    return %c0_i32, %c0_i32_0 : i32, i32
  }
  func.func @transform_3(%arg0: i32) -> (i32, i32) {
    %c0_i32 = arith.constant 0 : i32
    %c0_i32_0 = arith.constant 0 : i32
    return %arg0, %c0_i32 : i32, i32
  }
}

module attributes {stable_mosaic.version = 11 : i64} {
  func.func @_linear_pair_kernel(%arg0: i32, %arg1: memref<2x512xbf16, #tpu.memory_space<vmem>>, %arg2: memref<512x20xbf16, #tpu.memory_space<vmem>>, %arg3: memref<1x20xf32, #tpu.memory_space<vmem>>, %arg4: memref<20x256xbf16, #tpu.memory_space<vmem>>, %arg5: memref<1x256xf32, #tpu.memory_space<vmem>>, %arg6: memref<2x256xbf16, #tpu.memory_space<vmem>>) attributes {dimension_semantics = [#tpu.dimension_semantics<parallel>], iteration_bounds = array<i64: 2>, scalar_prefetch = 0 : i64, scratch_operands = 0 : i64, tpu.core_type = #tpu.core_type<tc>, window_params = [{pipeline_mode = #tpu.pipeline_mode<synchronous>, transform_indices = @transform_0, window_bounds = array<i64: 2, 512>}, {pipeline_mode = #tpu.pipeline_mode<synchronous>, transform_indices = @transform_1, window_bounds = array<i64: 512, 20>}, {pipeline_mode = #tpu.pipeline_mode<synchronous>, transform_indices = @transform_2, window_bounds = array<i64: 1, 20>}, {transform_indices = @transform_3, window_bounds = array<i64: 20, 256>}, {transform_indices = @transform_4, window_bounds = array<i64: 1, 256>}, {transform_indices = @transform_5, window_bounds = array<i64: 2, 256>}]} {
    %c0 = arith.constant 0 : index
    %c0_0 = arith.constant 0 : index
    %0 = vector.load %arg1[%c0, %c0_0] : memref<2x512xbf16, #tpu.memory_space<vmem>>, vector<2x512xbf16>
    %c0_1 = arith.constant 0 : index
    %c0_2 = arith.constant 0 : index
    %1 = vector.load %arg2[%c0_1, %c0_2] : memref<512x20xbf16, #tpu.memory_space<vmem>>, vector<512x20xbf16>
    %cst = arith.constant dense<0.000000e+00> : vector<2x20xf32>
    %2 = tpu.matmul %0, %1, %cst {dimension_numbers = #tpu.dot_dimension_numbers<[1], [0], [0], [1], [0, 0, 1, 1], [], []>} : vector<2x512xbf16>, vector<512x20xbf16>, vector<2x20xf32> -> vector<2x20xf32>
    %c0_3 = arith.constant 0 : index
    %c0_4 = arith.constant 0 : index
    %3 = vector.load %arg3[%c0_3, %c0_4] : memref<1x20xf32, #tpu.memory_space<vmem>>, vector<1x20xf32>
    %4 = vector.broadcast %3 : vector<1x20xf32> to vector<2x20xf32>
    %5 = arith.addf %2, %4 : vector<2x20xf32>
    %6 = math.tanh %5 : vector<2x20xf32>
    %7 = arith.truncf %6 : vector<2x20xf32> to vector<2x20xbf16>
    %c0_5 = arith.constant 0 : index
    %c0_6 = arith.constant 0 : index
    %8 = vector.load %arg4[%c0_5, %c0_6] : memref<20x256xbf16, #tpu.memory_space<vmem>>, vector<20x256xbf16>
    %cst_7 = arith.constant dense<0.000000e+00> : vector<2x256xf32>
    %9 = tpu.matmul %7, %8, %cst_7 {dimension_numbers = #tpu.dot_dimension_numbers<[1], [0], [0], [1], [0, 0, 1, 1], [], []>} : vector<2x20xbf16>, vector<20x256xbf16>, vector<2x256xf32> -> vector<2x256xf32>
    %c0_8 = arith.constant 0 : index
    %c0_9 = arith.constant 0 : index
    %10 = vector.load %arg5[%c0_8, %c0_9] : memref<1x256xf32, #tpu.memory_space<vmem>>, vector<1x256xf32>
    %11 = vector.broadcast %10 : vector<1x256xf32> to vector<2x256xf32>
    %12 = arith.addf %9, %11 : vector<2x256xf32>
    %cst_10 = arith.constant 0.000000e+00 : f32
    %13 = vector.broadcast %cst_10 : f32 to vector<2x256xf32>
    %14 = arith.cmpf oge, %12, %13 : vector<2x256xf32>
    %cst_11 = arith.constant 0.00999999977 : f32
    %15 = vector.broadcast %cst_11 : f32 to vector<2x256xf32>
    %16 = arith.mulf %15, %12 : vector<2x256xf32>
    %17 = arith.select %14, %12, %16 : vector<2x256xi1>, vector<2x256xf32>
    %18 = arith.truncf %17 : vector<2x256xf32> to vector<2x256xbf16>
    %c0_12 = arith.constant 0 : index
    %c0_13 = arith.constant 0 : index
    %19 = vector.load %arg6[%c0_12, %c0_13] : memref<2x256xbf16, #tpu.memory_space<vmem>>, vector<2x256xbf16>
    tpu.vector_store %arg6[%c0_12, %c0_13], %18 {strides = array<i32>} : memref<2x256xbf16, #tpu.memory_space<vmem>>, vector<2x256xbf16>,
    return
  }
  func.func @transform_0(%arg0: i32) -> (i32, i32) {
    %c0_i32 = arith.constant 0 : i32
    %c0_i32_0 = arith.constant 0 : i32
    %c0_i32_1 = arith.constant 0 : i32
    return %c0_i32, %c0_i32_0 : i32, i32
  }
  func.func @transform_1(%arg0: i32) -> (i32, i32) {
    %c0_i32 = arith.constant 0 : i32
    %c0_i32_0 = arith.constant 0 : i32
    %c0_i32_1 = arith.constant 0 : i32
    return %c0_i32, %c0_i32_0 : i32, i32
  }
  func.func @transform_2(%arg0: i32) -> (i32, i32) {
    %c0_i32 = arith.constant 0 : i32
    %c0_i32_0 = arith.constant 0 : i32
    %c0_i32_1 = arith.constant 0 : i32
    return %c0_i32, %c0_i32_0 : i32, i32
  }
  func.func @transform_3(%arg0: i32) -> (i32, i32) {
    %c0_i32 = arith.constant 0 : i32
    %c0_i32_0 = arith.constant 0 : i32
    return %c0_i32, %arg0 : i32, i32
  }
  func.func @transform_4(%arg0: i32) -> (i32, i32) {
    %c0_i32 = arith.constant 0 : i32
    %c0_i32_0 = arith.constant 0 : i32
    return %c0_i32, %arg0 : i32, i32
  }
  func.func @transform_5(%arg0: i32) -> (i32, i32) {
    %c0_i32 = arith.constant 0 : i32
    %c0_i32_0 = arith.constant 0 : i32
    return %c0_i32, %arg0 : i32, i32
  }
}

module attributes {stable_mosaic.version = 11 : i64} {
  func.func @_matmul_act_kernel(%arg0: i32, %arg1: memref<32x128xbf16, #tpu.memory_space<vmem>>, %arg2: memref<128x128xbf16, #tpu.memory_space<vmem>>, %arg3: memref<1x128xf32, #tpu.memory_space<vmem>>, %arg4: memref<32x128xbf16, #tpu.memory_space<vmem>>) attributes {dimension_semantics = [#tpu.dimension_semantics<parallel>], iteration_bounds = array<i64: 1>, scalar_prefetch = 0 : i64, scratch_operands = 0 : i64, tpu.core_type = #tpu.core_type<tc>, window_params = [{transform_indices = @transform_0, window_bounds = array<i64: 32, 128>}, {pipeline_mode = #tpu.pipeline_mode<synchronous>, transform_indices = @transform_1, window_bounds = array<i64: 128, 128>}, {pipeline_mode = #tpu.pipeline_mode<synchronous>, transform_indices = @transform_2, window_bounds = array<i64: 1, 128>}, {transform_indices = @transform_3, window_bounds = array<i64: 32, 128>}]} {
    %c0 = arith.constant 0 : index
    %c0_0 = arith.constant 0 : index
    %0 = vector.load %arg1[%c0, %c0_0] : memref<32x128xbf16, #tpu.memory_space<vmem>>, vector<32x128xbf16>
    %c0_1 = arith.constant 0 : index
    %c0_2 = arith.constant 0 : index
    %1 = vector.load %arg2[%c0_1, %c0_2] : memref<128x128xbf16, #tpu.memory_space<vmem>>, vector<128x128xbf16>
    %cst = arith.constant dense<0.000000e+00> : vector<32x128xf32>
    %2 = tpu.matmul %0, %1, %cst {dimension_numbers = #tpu.dot_dimension_numbers<[1], [0], [0], [1], [0, 0, 1, 1], [], []>} : vector<32x128xbf16>, vector<128x128xbf16>, vector<32x128xf32> -> vector<32x128xf32>
    %c0_3 = arith.constant 0 : index
    %c0_4 = arith.constant 0 : index
    %3 = vector.load %arg3[%c0_3, %c0_4] : memref<1x128xf32, #tpu.memory_space<vmem>>, vector<1x128xf32>
    %4 = vector.broadcast %3 : vector<1x128xf32> to vector<32x128xf32>
    %5 = arith.addf %2, %4 : vector<32x128xf32>
    %cst_5 = arith.constant 0.000000e+00 : f32
    %6 = vector.broadcast %cst_5 : f32 to vector<32x128xf32>
    %7 = arith.cmpf oge, %5, %6 : vector<32x128xf32>
    %cst_6 = arith.constant 0.00999999977 : f32
    %8 = vector.broadcast %cst_6 : f32 to vector<32x128xf32>
    %9 = arith.mulf %8, %5 : vector<32x128xf32>
    %10 = arith.select %7, %5, %9 : vector<32x128xi1>, vector<32x128xf32>
    %11 = arith.truncf %10 : vector<32x128xf32> to vector<32x128xbf16>
    %c0_7 = arith.constant 0 : index
    %c0_8 = arith.constant 0 : index
    %12 = vector.load %arg4[%c0_7, %c0_8] : memref<32x128xbf16, #tpu.memory_space<vmem>>, vector<32x128xbf16>
    tpu.vector_store %arg4[%c0_7, %c0_8], %11 {strides = array<i32>} : memref<32x128xbf16, #tpu.memory_space<vmem>>, vector<32x128xbf16>,
    return
  }
  func.func @transform_0(%arg0: i32) -> (i32, i32) {
    %c0_i32 = arith.constant 0 : i32
    %c0_i32_0 = arith.constant 0 : i32
    return %arg0, %c0_i32 : i32, i32
  }
  func.func @transform_1(%arg0: i32) -> (i32, i32) {
    %c0_i32 = arith.constant 0 : i32
    %c0_i32_0 = arith.constant 0 : i32
    %c0_i32_1 = arith.constant 0 : i32
    return %c0_i32, %c0_i32_0 : i32, i32
  }
  func.func @transform_2(%arg0: i32) -> (i32, i32) {
    %c0_i32 = arith.constant 0 : i32
    %c0_i32_0 = arith.constant 0 : i32
    %c0_i32_1 = arith.constant 0 : i32
    return %c0_i32, %c0_i32_0 : i32, i32
  }
  func.func @transform_3(%arg0: i32) -> (i32, i32) {
    %c0_i32 = arith.constant 0 : i32
    %c0_i32_0 = arith.constant 0 : i32
    return %arg0, %c0_i32 : i32, i32
  }
}

module attributes {stable_mosaic.version = 11 : i64} {
  func.func @_matmul_act_kernel(%arg0: i32, %arg1: memref<128x128xbf16, #tpu.memory_space<vmem>>, %arg2: memref<128x4xbf16, #tpu.memory_space<vmem>>, %arg3: memref<1x4xf32, #tpu.memory_space<vmem>>, %arg4: memref<128x4xf32, #tpu.memory_space<vmem>>) attributes {dimension_semantics = [#tpu.dimension_semantics<parallel>], iteration_bounds = array<i64: 1>, scalar_prefetch = 0 : i64, scratch_operands = 0 : i64, tpu.core_type = #tpu.core_type<tc>, window_params = [{transform_indices = @transform_0, window_bounds = array<i64: 128, 128>}, {pipeline_mode = #tpu.pipeline_mode<synchronous>, transform_indices = @transform_1, window_bounds = array<i64: 128, 4>}, {pipeline_mode = #tpu.pipeline_mode<synchronous>, transform_indices = @transform_2, window_bounds = array<i64: 1, 4>}, {transform_indices = @transform_3, window_bounds = array<i64: 128, 4>}]} {
    %c0 = arith.constant 0 : index
    %c0_0 = arith.constant 0 : index
    %0 = vector.load %arg1[%c0, %c0_0] : memref<128x128xbf16, #tpu.memory_space<vmem>>, vector<128x128xbf16>
    %c0_1 = arith.constant 0 : index
    %c0_2 = arith.constant 0 : index
    %1 = vector.load %arg2[%c0_1, %c0_2] : memref<128x4xbf16, #tpu.memory_space<vmem>>, vector<128x4xbf16>
    %cst = arith.constant dense<0.000000e+00> : vector<128x4xf32>
    %2 = tpu.matmul %0, %1, %cst {dimension_numbers = #tpu.dot_dimension_numbers<[1], [0], [0], [1], [0, 0, 1, 1], [], []>} : vector<128x128xbf16>, vector<128x4xbf16>, vector<128x4xf32> -> vector<128x4xf32>
    %c0_3 = arith.constant 0 : index
    %c0_4 = arith.constant 0 : index
    %3 = vector.load %arg3[%c0_3, %c0_4] : memref<1x4xf32, #tpu.memory_space<vmem>>, vector<1x4xf32>
    %4 = vector.broadcast %3 : vector<1x4xf32> to vector<128x4xf32>
    %5 = arith.addf %2, %4 : vector<128x4xf32>
    %cst_5 = arith.constant 0.000000e+00 : f32
    %6 = vector.broadcast %cst_5 : f32 to vector<128x4xf32>
    %7 = arith.subf %6, %5 : vector<128x4xf32>
    %8 = math.exp %7 : vector<128x4xf32>
    %cst_6 = arith.constant 1.000000e+00 : f32
    %9 = vector.broadcast %cst_6 : f32 to vector<128x4xf32>
    %10 = arith.addf %9, %8 : vector<128x4xf32>
    %cst_7 = arith.constant 1.000000e+00 : f32
    %11 = vector.broadcast %cst_7 : f32 to vector<128x4xf32>
    %12 = arith.divf %11, %10 : vector<128x4xf32>
    %c0_8 = arith.constant 0 : index
    %c0_9 = arith.constant 0 : index
    %13 = vector.load %arg4[%c0_8, %c0_9] : memref<128x4xf32, #tpu.memory_space<vmem>>, vector<128x4xf32>
    tpu.vector_store %arg4[%c0_8, %c0_9], %12 {strides = array<i32>} : memref<128x4xf32, #tpu.memory_space<vmem>>, vector<128x4xf32>,
    return
  }
  func.func @transform_0(%arg0: i32) -> (i32, i32) {
    %c0_i32 = arith.constant 0 : i32
    %c0_i32_0 = arith.constant 0 : i32
    return %arg0, %c0_i32 : i32, i32
  }
  func.func @transform_1(%arg0: i32) -> (i32, i32) {
    %c0_i32 = arith.constant 0 : i32
    %c0_i32_0 = arith.constant 0 : i32
    %c0_i32_1 = arith.constant 0 : i32
    return %c0_i32, %c0_i32_0 : i32, i32
  }
  func.func @transform_2(%arg0: i32) -> (i32, i32) {
    %c0_i32 = arith.constant 0 : i32
    %c0_i32_0 = arith.constant 0 : i32
    %c0_i32_1 = arith.constant 0 : i32
    return %c0_i32, %c0_i32_0 : i32, i32
  }
  func.func @transform_3(%arg0: i32) -> (i32, i32) {
    %c0_i32 = arith.constant 0 : i32
    %c0_i32_0 = arith.constant 0 : i32
    return %arg0, %c0_i32 : i32, i32
  }
}

</mosaic_0001>

<bundles_post_ra>
// kernel: tiny_autoencoder_forward.5
= control target key start
LH: loop header
LB: loop body
LE: loop exit
PB: predicated region body
PF: predicated region fallthrough
CT: control target
= control target key end

     0   :  { %vm110_vm0 = vcmask 1043456   ;;  %vm111_vm1 = vcmask 1044480   ;;  %vm85_vm2 = vcmask 72704   ;;  %v436_v1 = vmov 65535   ;;  %s578_s1 = inlined_call_operand.vmem [shape: bf16[9,32], index: 1, kind: input, shape index: {}]   ;;  %s579_s0 = inlined_call_operand.vmem [shape: bf16[128,9], index: 0, kind: input, shape index: {}]   ;;  %s580_s2 = inlined_call_operand.vmem [shape: f32[1,32], index: 2, kind: input, shape index: {}]   ;;  %s581_s3 = inlined_call_operand.vmem [shape: bf16[128,32], index: 3, kind: output, shape index: {}]  }
   0x1   :  { %v427_v0 = vld [vmem:[%s578_s1] sm:$0x1f]   ;;  %v112_v2 = vsel %vm110_vm0, 4294967295, %v436_v1  ;;  %v430_v7 = vld [vmem:[%s579_s0 + $0x8] sm:$0xff]   ;;  %v432_v9 = vld [vmem:[%s579_s0 + $0x10] sm:$0xff]   ;;  %vm326_vm5 = vcmask 257024  }
   0x2   :  { %v428_v3 = vld [vmem:[%s579_s0] sm:$0xff]   ;;  %v113_v4 = vsel %vm111_vm1, %v112_v2, 0  ;;  %v431_v8 = vld [vmem:[%s579_s0 + $0x28] sm:$0xff]   ;;  %v433_v10 = vld [vmem:[%s579_s0 + $0x30] sm:$0xff]  }
   0x3   :  { %v429_v5 = vld [vmem:[%s579_s0 + $0x20] sm:$0xff]   ;;  %v115_v6 = vand.u32 %v427_v0, %v113_v4  ;;  %408 = vmatprep.mubr.msk.bf16.mxu0 %vm85_vm2, %v428_v3  ;;  %v434_v11 = vld [vmem:[%s579_s0 + $0x18] sm:$0xff]  }
   0x4   :  { %416 = vmatprep.mubr.msk.bf16.mxu1 %vm85_vm2, %v429_v5  ;;  %v435_v12 = vld [vmem:[%s579_s0 + $0x38] sm:$0xff]   ;;  %v495_v13 = vld [vmem:[%s580_s2] ss:$0 sm:$0xff] }
   0x5   :  { %406 = vmatprep.subr.bf16.mxu0 %v115_v6  ;;  %424 = vmatprep.subr.bf16.mxu1 %v115_v6 }
   0x6   :  { %407 = vmatpush3.bf16.msra.mxu0 %v115_v6  ;;  %425 = vmatpush3.bf16.msra.mxu1 %v115_v6 }
   0x9   :  { %409 = vmatmul.mubr.msk.bf16.vlgmr.msra.gmra.mxu0 %vm85_vm2, %v430_v7  ;;  %417 = vmatmul.mubr.msk.bf16.vlgmr.msra.gmra.mxu1 %vm85_vm2, %v431_v8 }
   0xa   :  { %412 = vmatprep.mubr.msk.bf16.mxu0 %vm85_vm2, %v432_v9  ;;  %420 = vmatprep.mubr.msk.bf16.mxu1 %vm85_vm2, %v433_v10 }
  0x11   :  { %413 = vmatmul.mubr.msk.bf16.gmra.mxu0 %vm85_vm2, %v434_v11  ;;  %421 = vmatmul.mubr.msk.bf16.gmra.mxu1 %vm85_vm2, %v435_v12 }
  0xc9   :  { %v410_v14 = vpop.f32.mrf.mxu0  ;;  %v418_v15 = vpop.f32.mrf.mxu1 }
  0xca   :  { %v160_v16 = vadd.f32 %v410_v14, %v495_v13  ;;  %v192_v17 = vadd.f32 %v418_v15, %v495_v13 }
  0xcb   :  { %v151_v18 = vpop.f32.mrf.mxu0  ;;  %v183_v19 = vpop.f32.mrf.mxu1 }
  0xcc   :  { %vm216_vm3 = vcmp.ge.f32.partialorder %v160_v16, 0.0  ;;  %v232_v20 = vmul.f32 0.01, %v160_v16  ;;  %vm224_vm4 = vcmp.ge.f32.partialorder %v192_v17, 0.0  ;;  %v240_v21 = vmul.f32 0.01, %v192_v17 }
  0xcd   :  { %v152_v22 = vadd.f32 %v495_v13, %v151_v18  ;;  %v184_v23 = vadd.f32 %v495_v13, %v183_v19  ;;  %v411_v24 = vpop.f32.mrf.mxu0  ;;  %v419_v25 = vpop.f32.mrf.mxu1 }
  0xce   :  { %v248_v26 = vsel %vm216_vm3, %v160_v16, %v232_v20  ;;  %v256_v27 = vsel %vm224_vm4, %v192_v17, %v240_v21  ;;  %v163_v28 = vadd.f32 %v411_v24, %v495_v13  ;;  %v195_v29 = vadd.f32 %v419_v25, %v495_v13 }
  0xcf   :  { %v383_v30 = vpack.c.bf16 %v248_v26, %v248_v26  ;;  %v391_v31 = vpack.c.bf16 %v256_v27, %v256_v27  ;;  %vm214_vm6 = vcmp.ge.f32.partialorder %v152_v22, 0.0  ;;  %v230_v32 = vmul.f32 0.01, %v152_v22  ;;  %v154_v33 = vpop.f32.mrf.mxu0  ;;  %v186_v34 = vpop.f32.mrf.mxu1 }
  0xd0   :  { %vm222_vm7 = vcmp.ge.f32.partialorder %v184_v23, 0.0  ;;  %v238_v35 = vmul.f32 0.01, %v184_v23  ;;  %vm217_vm8 = vcmp.ge.f32.partialorder %v163_v28, 0.0  ;;  %v233_v36 = vmul.f32 0.01, %v163_v28 }
  0xd1   :  { %329 = vst.msk [vmem:[%s581_s3 + $0x8] sm:$0xf] %vm326_vm5, %v383_v30  ;;  %337 = vst.msk [vmem:[%s581_s3 + $0x28] sm:$0xf] %vm326_vm5, %v391_v31  ;;  %v246_v37 = vsel %vm214_vm6, %v152_v22, %v230_v32  ;;  %vm225_vm9 = vcmp.ge.f32.partialorder %v195_v29, 0.0  ;;  %v155_v39 = vadd.f32 %v495_v13, %v154_v33  ;;  %v414_v40 = vpop.f32.mrf.mxu0  ;;  %v422_v41 = vpop.f32.mrf.mxu1  ;;  %v187_v45 = vadd.f32 %v495_v13, %v186_v34 }
  0xd2   :  { %v241_v38 = vmul.f32 0.01, %v195_v29  ;;  %v381_v42 = vpack.c.bf16 %v246_v37, %v246_v37  ;;  %v254_v43 = vsel %vm222_vm7, %v184_v23, %v238_v35  ;;  %v249_v44 = vsel %vm217_vm8, %v163_v28, %v233_v36 }
  0xd3   :  { %v389_v46 = vpack.c.bf16 %v254_v43, %v254_v43  ;;  %v384_v47 = vpack.c.bf16 %v249_v44, %v249_v44  ;;  %vm215_vm10 = vcmp.ge.f32.partialorder %v155_v39, 0.0  ;;  %v167_v49 = vpop.f32.mrf.mxu0  ;;  %v199_v50 = vpop.f32.mrf.mxu1  ;;  %v231_v52 = vmul.f32 0.01, %v155_v39 }
  0xd4   :  { %v257_v48 = vsel %vm225_vm9, %v195_v29, %v241_v38  ;;  %327 = vst.msk [vmem:[%s581_s3] sm:$0xf] %vm326_vm5, %v381_v42  ;;  %vm223_vm11 = vcmp.ge.f32.partialorder %v187_v45, 0.0  ;;  %v239_v53 = vmul.f32 0.01, %v187_v45  ;;  %v176_v54 = vadd.f32 %v414_v40, %v495_v13 }
  0xd5   :  { %v392_v51 = vpack.c.bf16 %v257_v48, %v257_v48  ;;  %335 = vst.msk [vmem:[%s581_s3 + $0x20] sm:$0xf] %vm326_vm5, %v389_v46  ;;  %330 = vst.msk [vmem:[%s581_s3 + $0xc] sm:$0xf] %vm326_vm5, %v384_v47  ;;  %v208_v55 = vadd.f32 %v422_v41, %v495_v13  ;;  %v168_v56 = vadd.f32 %v495_v13, %v167_v49  ;;  %v415_v58 = vpop.f32.mrf.mxu0  ;;  %v423_v59 = vpop.f32.mrf.mxu1 }
  0xd6   :  { %v200_v57 = vadd.f32 %v495_v13, %v199_v50  ;;  %v247_v60 = vsel %vm215_vm10, %v155_v39, %v231_v52  ;;  %v255_v61 = vsel %vm223_vm11, %v187_v45, %v239_v53  ;;  %v179_v62 = vadd.f32 %v415_v58, %v495_v13 }
  0xd7   :  { %338 = vst.msk [vmem:[%s581_s3 + $0x2c] sm:$0xf] %vm326_vm5, %v392_v51  ;;  %v211_v63 = vadd.f32 %v423_v59, %v495_v13  ;;  %v382_v0 = vpack.c.bf16 %v247_v60, %v247_v60  ;;  %v390_v1 = vpack.c.bf16 %v255_v61, %v255_v61  ;;  %vm220_vm12 = vcmp.ge.f32.partialorder %v176_v54, 0.0  ;;  %v170_v7 = vpop.f32.mrf.mxu0  ;;  %v202_v12 = vpop.f32.mrf.mxu1 }
  0xd8   :  { %v236_v2 = vmul.f32 0.01, %v176_v54  ;;  %vm228_vm13 = vcmp.ge.f32.partialorder %v208_v55, 0.0  ;;  %v244_v3 = vmul.f32 0.01, %v208_v55  ;;  %vm218_vm14 = vcmp.ge.f32.partialorder %v168_v56, 0.0 }
  0xd9   :  { %v234_v4 = vmul.f32 0.01, %v168_v56  ;;  %328 = vst.msk [vmem:[%s581_s3 + $0x4] sm:$0xf] %vm326_vm5, %v382_v0  ;;  %336 = vst.msk [vmem:[%s581_s3 + $0x24] sm:$0xf] %vm326_vm5, %v390_v1  ;;  %v171_v20 = vadd.f32 %v495_v13, %v170_v7  ;;  %v203_v22 = vadd.f32 %v495_v13, %v202_v12 }
  0xda   :  { %v252_v5 = vsel %vm220_vm12, %v176_v54, %v236_v2  ;;  %vm226_vm15 = vcmp.ge.f32.partialorder %v200_v57, 0.0  ;;  %v242_v6 = vmul.f32 0.01, %v200_v57  ;;  %vm221_vm0 = vcmp.ge.f32.partialorder %v179_v62, 0.0 }
  0xdb   :  { %v387_v8 = vpack.c.bf16 %v252_v5, %v252_v5  ;;  %v260_v9 = vsel %vm228_vm13, %v208_v55, %v244_v3  ;;  %v250_v10 = vsel %vm218_vm14, %v168_v56, %v234_v4  ;;  %v237_v11 = vmul.f32 0.01, %v179_v62 }
  0xdc   :  { %v395_v14 = vpack.c.bf16 %v260_v9, %v260_v9  ;;  %v385_v15 = vpack.c.bf16 %v250_v10, %v250_v10  ;;  %v258_v16 = vsel %vm226_vm15, %v200_v57, %v242_v6  ;;  %vm229_vm1 = vcmp.ge.f32.partialorder %v211_v63, 0.0 }
  0xdd   :  { %333 = vst.msk [vmem:[%s581_s3 + $0x18] sm:$0xf] %vm326_vm5, %v387_v8  ;;  %v393_v17 = vpack.c.bf16 %v258_v16, %v258_v16  ;;  %v253_v18 = vsel %vm221_vm0, %v179_v62, %v237_v11  ;;  %v245_v19 = vmul.f32 0.01, %v211_v63  ;;  %vm219_vm2 = vcmp.ge.f32.partialorder %v171_v20, 0.0 }
  0xde   :  { %341 = vst.msk [vmem:[%s581_s3 + $0x38] sm:$0xf] %vm326_vm5, %v395_v14  ;;  %331 = vst.msk [vmem:[%s581_s3 + $0x10] sm:$0xf] %vm326_vm5, %v385_v15  ;;  %v388_v21 = vpack.c.bf16 %v253_v18, %v253_v18  ;;  %v235_v24 = vmul.f32 0.01, %v171_v20 }
  0xdf   :  { %339 = vst.msk [vmem:[%s581_s3 + $0x30] sm:$0xf] %vm326_vm5, %v393_v17  ;;  %v261_v23 = vsel %vm229_vm1, %v211_v63, %v245_v19  ;;  %vm227_vm3 = vcmp.ge.f32.partialorder %v203_v22, 0.0  ;;  %v243_v26 = vmul.f32 0.01, %v203_v22 }
  0xe0   :  { %334 = vst.msk [vmem:[%s581_s3 + $0x1c] sm:$0xf] %vm326_vm5, %v388_v21  ;;  %v396_v25 = vpack.c.bf16 %v261_v23, %v261_v23  ;;  %v251_v27 = vsel %vm219_vm2, %v171_v20, %v235_v24 }
  0xe1   :  { %v386_v13 = vpack.c.bf16 %v251_v27, %v251_v27  ;;  %v259_v28 = vsel %vm227_vm3, %v203_v22, %v243_v26 }
  0xe2   :  { %342 = vst.msk [vmem:[%s581_s3 + $0x3c] sm:$0xf] %vm326_vm5, %v396_v25  ;;  %v394_v29 = vpack.c.bf16 %v259_v28, %v259_v28 }
  0xe3   :  { %332 = vst.msk [vmem:[%s581_s3 + $0x14] sm:$0xf] %vm326_vm5, %v386_v13 }
  0xe4   :  { %340 = vst.msk [vmem:[%s581_s3 + $0x34] sm:$0xf] %vm326_vm5, %v394_v29 }

// kernel: tiny_autoencoder_forward.6
= control target key start
LH: loop header
LB: loop body
LE: loop exit
PB: predicated region body
PF: predicated region fallthrough
CT: control target
= control target key end

     0   :  { %vm204_vm0 = vcmask 261120   ;;  %vm337_vm2 = vcmask 257024   ;;  %s558_s1 = inlined_call_operand.vmem [shape: bf16[288,32], index: 1, kind: input, shape index: {}]   ;;  %s559_s0 = inlined_call_operand.vmem [shape: bf16[32,288], index: 0, kind: input, shape index: {}]   ;;  %s560_s2 = inlined_call_operand.vmem [shape: f32[1,32], index: 2, kind: input, shape index: {}]   ;;  %s561_s3 = inlined_call_operand.vmem [shape: bf16[32,32], index: 3, kind: output, shape index: {}]  }
   0x1   :  { %v421_v0 = vld [vmem:[%s558_s1 + $0x78] sm:$0xff]   ;;  %v423_v2 = vld [vmem:[%s558_s1 + $0x70] sm:$0xff]   ;;  %v425_v4 = vld [vmem:[%s558_s1 + $0x68] sm:$0xff]  }
   0x2   :  { %v422_v1 = vld [vmem:[%s558_s1 + $0x38] sm:$0xff]   ;;  %381 = vmatprep.subr.bf16.mxu0 %v421_v0  ;;  %v424_v3 = vld [vmem:[%s558_s1 + $0x30] sm:$0xff]   ;;  %v426_v5 = vld [vmem:[%s558_s1 + $0x28] sm:$0xff]  }
   0x3   :  { %382 = vmatpush3.bf16.msra.mxu0 %v422_v1  ;;  %v427_v6 = vld [vmem:[%s558_s1 + $0x60] sm:$0xff]   ;;  %v429_v8 = vld [vmem:[%s558_s1 + $0x58] sm:$0xff]   ;;  %v436_v10 = vld [vmem:[%s558_s1 + $0x88] sm:$0xff]  }
   0x4   :  { %383 = vmatprep.subr.bf16.mxu0 %v423_v2  ;;  %v428_v7 = vld [vmem:[%s558_s1 + $0x20] sm:$0xff]   ;;  %v430_v9 = vld [vmem:[%s558_s1 + $0x18] sm:$0xff]   ;;  %v431_v11 = vld [vmem:[%s558_s1 + $0x50] sm:$0xff]   ;;  %413 = vmatprep.subr.bf16.mxu1 %v436_v10 }
   0x5   :  { %v432_v12 = vld [vmem:[%s558_s1 + $0x10] sm:$0xff]   ;;  %v433_v13 = vld [vmem:[%s558_s1 + $0x48] sm:$0xff]   ;;  %414 = vmatpush3.bf16.msra.mxu1 %v436_v10  ;;  %v441_v15 = vld [vmem:[%s558_s1 + $0x80] sm:$0xff]  }
   0x6   :  { %v440_v14 = vld [vmem:[%s559_s0 + $0x4] ss:$12 sps:$4 sm:$0xff]   ;;  %v442_v16 = vld [vmem:[%s559_s0 + $0x8] ss:$12 sps:$4 sm:$0xff]   ;;  %415 = vmatprep.subr.bf16.mxu1 %v441_v15  ;;  %v443_v17 = vld [vmem:[%s559_s0 + $0x20] ss:$12 sps:$4 sm:$0xff]  }
   0x7   :  { %384 = vmatpush3.bf16.msra.mxu0 %v424_v3  ;;  %243 = vmatprep.mubr.bf16.mxu0 %v440_v14  ;;  %v434_v18 = vld [vmem:[%s558_s1 + $0x8] sm:$0xff]   ;;  %v435_v19 = vld [vmem:[%s558_s1 + $0x40] sm:$0xff]  }
   0x8   :  { %385 = vmatprep.subr.bf16.mxu0 %v425_v4  ;;  %417 = vmatprep.mubr.msk.bf16.mxu1 %vm204_vm0, %v442_v16  ;;  %v437_v20 = vld [vmem:[%s558_s1] sm:$0xff]   ;;  %v444_v22 = vld [vmem:[%s559_s0 + $0x1c] ss:$12 sps:$4 sm:$0xff]  }
   0x9   :  { %416 = vmatpush3.bf16.msra.mxu1 %v441_v15  ;;  %v438_v21 = vld [vmem:[%s559_s0] ss:$12 sps:$4 sm:$0xff]   ;;  %v446_v23 = vld [vmem:[%s559_s0 + $0x18] ss:$12 sps:$4 sm:$0xff]  }
   0xa   :  { %v346_v28 = vld [vmem:[%s560_s2] ss:$0 sm:$0xff] }
   0xb   :  { %386 = vmatpush3.bf16.msra.mxu0 %v426_v5 }
   0xc   :  { %387 = vmatprep.subr.bf16.mxu0 %v427_v6  ;;  %418 = vmatmul.mubr.msk.bf16.vlgmr.msra.gmra.mxu1 %vm204_vm0, %v443_v17 }
   0xf   :  { %388 = vmatpush3.bf16.msra.mxu0 %v428_v7 }
  0x10   :  { %389 = vmatprep.subr.bf16.mxu0 %v429_v8 }
  0x13   :  { %390 = vmatpush3.bf16.msra.mxu0 %v430_v9 }
  0x14   :  { %391 = vmatprep.subr.bf16.mxu0 %v431_v11 }
  0x17   :  { %392 = vmatpush3.bf16.msra.mxu0 %v432_v12 }
  0x18   :  { %393 = vmatprep.subr.bf16.mxu0 %v433_v13 }
  0x1b   :  { %394 = vmatpush3.bf16.msra.mxu0 %v434_v18 }
  0x1c   :  { %395 = vmatprep.subr.bf16.mxu0 %v435_v19 }
  0x1f   :  { %396 = vmatpush3.bf16.msra.mxu0 %v437_v20 }
  0x22   :  { %244 = vmatmul.mubr.bf16.vlgmr.msra.gmra.mxu0 %v438_v21 }
  0x23   :  { %251 = vmatprep.mubr.bf16.mxu0 %v444_v22 }
  0x2a   :  { %252 = vmatmul.mubr.bf16.gmra.mxu0 %v446_v23 }
  0xcc   :  { %v419_v24 = vpop.f32.mrf.mxu1 }
  0xce   :  { %v294_v26 = vpop.f32.mrf.mxu1 }
  0xd0   :  { %v420_v31 = vpop.f32.mrf.mxu1 }
  0xd2   :  { %v297_v37 = vpop.f32.mrf.mxu1 }
  0xe2   :  { %v397_v25 = vpop.f32.mrf.mxu0 }
  0xe4   :  { %v398_v27 = vpop.f32.mrf.mxu0 }
  0xe5   :  { %v399_v29 = vadd.f32 %v398_v27, %v397_v25 }
  0xe6   :  { %v400_v30 = vpop.f32.mrf.mxu0 }
  0xe7   :  { %v246_v32 = vadd.f32 %v399_v29, %v346_v28 }
  0xe8   :  { %v401_v33 = vpop.f32.mrf.mxu0 }
  0xe9   :  { %v402_v34 = vadd.f32 %v401_v33, %v400_v30  ;;  %v295_v35 = vadd.f32 %v294_v26, %v246_v32 }
  0xea   :  { %v403_v36 = vpop.f32.mrf.mxu0 }
  0xeb   :  { %vm309_vm1 = vcmp.ge.f32.partialorder %v295_v35, 0.0  ;;  %v313_v38 = vmul.f32 0.01, %v295_v35  ;;  %v249_v39 = vadd.f32 %v402_v34, %v346_v28 }
  0xec   :  { %v404_v40 = vpop.f32.mrf.mxu0 }
  0xed   :  { %v317_v41 = vsel %vm309_vm1, %v295_v35, %v313_v38  ;;  %v405_v42 = vadd.f32 %v404_v40, %v403_v36  ;;  %v298_v43 = vadd.f32 %v297_v37, %v249_v39 }
  0xee   :  { %v377_v44 = vpack.c.bf16 %v317_v41, %v317_v41  ;;  %v406_v45 = vpop.f32.mrf.mxu0 }
  0xef   :  { %v254_v46 = vadd.f32 %v405_v42, %v346_v28  ;;  %vm310_vm3 = vcmp.ge.f32.partialorder %v298_v43, 0.0  ;;  %v314_v47 = vmul.f32 0.01, %v298_v43 }
  0xf0   :  { %338 = vst.msk [vmem:[%s561_s3] sm:$0xf] %vm337_vm2, %v377_v44  ;;  %v407_v48 = vpop.f32.mrf.mxu0 }
  0xf1   :  { %v303_v49 = vadd.f32 %v419_v24, %v254_v46  ;;  %v318_v50 = vsel %vm310_vm3, %v298_v43, %v314_v47  ;;  %v408_v51 = vadd.f32 %v407_v48, %v406_v45 }
  0xf2   :  { %v378_v52 = vpack.c.bf16 %v318_v50, %v318_v50 }
  0xf3   :  { %vm311_vm4 = vcmp.ge.f32.partialorder %v303_v49, 0.0  ;;  %v315_v53 = vmul.f32 0.01, %v303_v49  ;;  %v257_v54 = vadd.f32 %v408_v51, %v346_v28 }
  0xf4   :  { %339 = vst.msk [vmem:[%s561_s3 + $0x4] sm:$0xf] %vm337_vm2, %v378_v52 }
  0xf5   :  { %v319_v55 = vsel %vm311_vm4, %v303_v49, %v315_v53  ;;  %v306_v56 = vadd.f32 %v420_v31, %v257_v54 }
  0xf6   :  { %v379_v57 = vpack.c.bf16 %v319_v55, %v319_v55 }
  0xf7   :  { %vm312_vm5 = vcmp.ge.f32.partialorder %v306_v56, 0.0  ;;  %v316_v58 = vmul.f32 0.01, %v306_v56 }
  0xf8   :  { %340 = vst.msk [vmem:[%s561_s3 + $0x8] sm:$0xf] %vm337_vm2, %v379_v57 }
  0xf9   :  { %v320_v59 = vsel %vm312_vm5, %v306_v56, %v316_v58 }
  0xfa   :  { %v380_v60 = vpack.c.bf16 %v320_v59, %v320_v59 }
  0xfc   :  { %341 = vst.msk [vmem:[%s561_s3 + $0xc] sm:$0xf] %vm337_vm2, %v380_v60 }

// kernel: tiny_autoencoder_forward.7
= control target key start
LH: loop header
LB: loop body
LE: loop exit
PB: predicated region body
PF: predicated region fallthrough
CT: control target
= control target key end

     0   :  { %s1059_s18 = smov 0   ;;  %s1061_s19 = smov 0   ;;  %s1221_s0 = inlined_call_operand.vmem [shape: bf16[2,512], index: 0, kind: input, shape index: {}]   ;;  %s1222_s1 = inlined_call_operand.vmem [shape: bf16[512,20], index: 1, kind: input, shape index: {}]   ;;  %s1223_s2 = inlined_call_operand.vmem [shape: f32[1,20], index: 2, kind: input, shape index: {}]   ;;  %s1224_s3 = inlined_call_operand.vmem [shape: bf16[20,512], index: 3, kind: input, shape index: {}]   ;;  %s1225_s4 = inlined_call_operand.vmem [shape: f32[1,512], index: 4, kind: input, shape index: {}]   ;;  %s1226_s5 = inlined_call_operand.vmem [shape: bf16[2,512], index: 5, kind: output, shape index: {}]  }
   0x1   :  { %s1063_s20 = smov 0  }
   0x2 LB: > { %s838_s21 = sadd.s32 4294967295, %s1025_s20   ;;  %s1076_s22 = sadd.s32 1, %s1025_s20   ;;  %s1025_s20 = sphi %s1063_s20, %s1229_s20   ;;  %s1021_s19 = sphi %s1061_s19, %s1228_s19   ;;  %s1017_s18 = sphi %s1059_s18, %s1227_s18  }
   0x3   : > { %s82_s23 = ssub.s32 %s1025_s20, %s1076_s22  ;;  %s85_s24 = sadd.s32 1, %s1021_s19 }
   0x4   : > { %p83_p0 = scmp.eq.s32.totalorder %s82_s23, 0  ;;  %p92_p1 = scmp.ne.s32.totalorder %s1021_s19, %s1017_s18 }
   0x5   : > { %p93_p2 = scmp.eq.s32.totalorder %s1025_s20, 0  ;;  %p841_p4 = scmp.ge.s32.totalorder %s1025_s20, 2 }
   0x6   : > { %s1085_s25 = scalar_select %p83_p0, %s1021_s19, %s85_s24  }
   0x7   : > { %p94_p3 = por %p93_p2, %p92_p1  ;;  %179 = sbr.rel (%p841_p4) target bundleno = 18 (0x12), region = 28 }
   0xc   : > { %182 = sbr.rel (!%p94_p3) target bundleno = 18 (0x12), region = 32  ;;  %s184_s26 = sand.u32 (%p94_p3), 1, %s1021_s19  }
   0xd   : > { %s891_s27 = sshll.u32 (%p94_p3), %s1025_s20, 3  ;;  %s936_s28 = smul.u32 (%p94_p3), 24, %s184_s26 }
   0xe   : > { %s189_s6 = scalar_lea.vmem (%p94_p3), %s1224_s3, %s891_s27 }
   0xf   : > { %v222_v0 = vld [vmem:[%s189_s6] sm:$0xff] (%p94_p3)  ;;  %v224_v1 = vld [vmem:[%s189_s6 + $0x10] sm:$0xff] (%p94_p3)  ;;  %s186_s7 = scalar_lea.vmem (%p94_p3), [#allocation2], %s936_s28 }
  0x10   : > { %v226_v2 = vld [vmem:[%s189_s6 + $0x20] sm:$0xff] (%p94_p3)  ;;  %223 = vst [vmem:[%s186_s7] sm:$0xff] (%p94_p3), %v222_v0  ;;  %225 = vst [vmem:[%s186_s7 + $0x8] sm:$0xff] (%p94_p3), %v224_v1 }
  0x11   : > { %227 = vst [vmem:[%s186_s7 + $0x10] sm:$0xff] %v226_v2 }
  0x12 PF: > { %p844_p5 = scmp.ge.s32.totalorder %s1025_s20, 1  ;;  %p240_p6 = scmp.lt.s32.totalorder %s1025_s20, 3 }
  0x14   : > { %p241_p7 = pnand %p844_p5, %p240_p6 }
  0x15   : > { %s247_s17 = sand.u32 (!%p241_p7), 1, %s1017_s18   ;;  %s845_s18 = sshll.u32 (!%p241_p7), %s838_s21, 1 }
  0x16   : > { %244 = sbr.rel (%p241_p7) target bundleno = 483 (0x1e3), region = 74  ;;  %p279_p8 = scmp.lt.s32.totalorder (!%p241_p7), %s845_s18, 3 }
  0x17   : > { %s937_s23 = smul.u32 (!%p241_p7), 24, %s247_s17 }
  0x19   : > { %s249_s24 = scalar_lea.vmem (!%p241_p7), [#allocation2], %s937_s23 }
  0x1b   : > { %v964_v3 = vld [vmem:[%s1222_s1 + $0x78] sm:$0xff]   ;;  %v968_v7 = vld [vmem:[%s1222_s1 + $0x70] sm:$0xff]   ;;  %v972_v11 = vld [vmem:[%s1222_s1 + $0x68] sm:$0xff]   ;;  %v373_v33 = vlaneseq  ;;  %v1027_v37 = vmov 1966171168   ;;  %vm698_vm0 = vcmask 1041408  }
  0x1c   : > { %v965_v4 = vld [vmem:[%s1222_s1 + $0xf8] sm:$0xff]   ;;  %892 = vmatprep.subr.bf16.mxu0 %v964_v3  ;;  %v969_v8 = vld [vmem:[%s1222_s1 + $0xf0] sm:$0xff]   ;;  %v973_v12 = vld [vmem:[%s1222_s1 + $0xe8] sm:$0xff]   ;;  %v371_v38 = vunpack.c.l.s4 %v1027_v37  ;;  %v1028_v53 = vmov 0   ;;  %vm694_vm1 = vcmask 162816   ;;  %s1231_s18 = smov (!%p279_p8, %s845_s18), 3 }
  0x1d   : > { %v966_v5 = vld [vmem:[%s1222_s1 + $0x38] sm:$0xff]   ;;  %914 = vmatprep.subr.bf16.mxu1 %v965_v4  ;;  %v970_v9 = vld [vmem:[%s1222_s1 + $0x30] sm:$0xff]   ;;  %v974_v13 = vld [vmem:[%s1222_s1 + $0x28] sm:$0xff]   ;;  %v374_v39 = vshrl.u32 %v373_v33, 7  ;;  %s281_s30 = scalar_lea.vmem %s1225_s4, %s1231_s18  ;;  %s286_s6 = scalar_lea.vmem %s1226_s5, %s1231_s18 }
  0x1e   : > { %v967_v6 = vld [vmem:[%s1222_s1 + $0xb8] sm:$0xff]   ;;  %893 = vmatpush3.bf16.msra.mxu0 %v966_v5  ;;  %v971_v10 = vld [vmem:[%s1222_s1 + $0xb0] sm:$0xff]   ;;  %v975_v14 = vld [vmem:[%s1222_s1 + $0xa8] sm:$0xff]   ;;  %v372_v41 = vunpack.c.0.s8 %v371_v38 }
  0x1f   : > { %915 = vmatpush3.bf16.msra.mxu1 %v967_v6  ;;  %894 = vmatprep.subr.bf16.mxu0 %v968_v7  ;;  %v976_v15 = vld [vmem:[%s1222_s1 + $0x60] sm:$0xff]   ;;  %v980_v19 = vld [vmem:[%s1222_s1 + $0x58] sm:$0xff]   ;;  %v984_v23 = vld [vmem:[%s1222_s1 + $0x50] sm:$0xff]   ;;  %v671_v5 = vsub.s32 0, %v374_v39  ;;  %v675_v7 = vsub.s32 1, %v374_v39 }
  0x20   : > { %916 = vmatprep.subr.bf16.mxu1 %v969_v8  ;;  %v977_v16 = vld [vmem:[%s1222_s1 + $0xe0] sm:$0xff]   ;;  %v981_v20 = vld [vmem:[%s1222_s1 + $0xd8] sm:$0xff]   ;;  %v985_v24 = vld [vmem:[%s1222_s1 + $0xd0] sm:$0xff]   ;;  %v1194_v42 = vsub.s32 %v372_v41, %v374_v39 }
  0x21   : > { %v978_v17 = vld [vmem:[%s1222_s1 + $0x20] sm:$0xff]   ;;  %v982_v21 = vld [vmem:[%s1222_s1 + $0x18] sm:$0xff]   ;;  %v986_v25 = vld [vmem:[%s1222_s1 + $0x10] sm:$0xff]  }
  0x22   : > { %895 = vmatpush3.bf16.msra.mxu0 %v970_v9  ;;  %v979_v18 = vld [vmem:[%s1222_s1 + $0xa0] sm:$0xff]   ;;  %v983_v22 = vld [vmem:[%s1222_s1 + $0x98] sm:$0xff]   ;;  %v987_v26 = vld [vmem:[%s1222_s1 + $0x90] sm:$0xff]  }
  0x23   : > { %917 = vmatpush3.bf16.msra.mxu1 %v971_v10  ;;  %896 = vmatprep.subr.bf16.mxu0 %v972_v11  ;;  %v988_v27 = vld [vmem:[%s1222_s1 + $0x48] sm:$0xff]   ;;  %v992_v31 = vld [vmem:[%s1222_s1 + $0x40] sm:$0xff]  }
  0x24   : > { %918 = vmatprep.subr.bf16.mxu1 %v973_v12  ;;  %v989_v28 = vld [vmem:[%s1222_s1 + $0xc8] sm:$0xff]   ;;  %v993_v32 = vld [vmem:[%s1222_s1 + $0xc0] sm:$0xff]  }
  0x25   : > { %v990_v29 = vld [vmem:[%s1222_s1 + $0x8] sm:$0xff]   ;;  %v994_v34 = vld [vmem:[%s1222_s1] sm:$0xff]  }
  0x26   : > { %897 = vmatpush3.bf16.msra.mxu0 %v974_v13  ;;  %v991_v30 = vld [vmem:[%s1222_s1 + $0x88] sm:$0xff]   ;;  %v995_v35 = vld [vmem:[%s1222_s1 + $0x80] sm:$0xff]  }
  0x27   : > { %919 = vmatpush3.bf16.msra.mxu1 %v975_v14  ;;  %898 = vmatprep.subr.bf16.mxu0 %v976_v15  ;;  %v848_v36 = vld.sshfl [vmem:[%s1221_s0] sm:$0x33 pattern:$0x75316420]  ;;  %v666_v47 = vld [vmem:[%s249_s24 + $0x10] sm:$0x33] }
  0x28   : > { %920 = vmatprep.subr.bf16.mxu1 %v977_v16  ;;  %v369_v40 = vcombine.high %v848_v36, %v848_v36  ;;  %v376_v44 = vrot.slane %v848_v36, %v1194_v42  ;;  %v884_v48 = vcombine.high %v666_v47, %v666_v47  ;;  %v883_v49 = vcombine.low %v666_v47, %v666_v47  ;;  %v1000_v51 = vld [vmem:[%s249_s24 + $0x4] ss:$8 sps:$4 sm:$0xff]   ;;  %v998_v52 = vld [vmem:[%s249_s24] ss:$8 sps:$4 sm:$0xff]  }
  0x29   : > { %v847_v56 = vld [vmem:[%s1223_s2] ss:$0 sm:$0xff] }
  0x2a   : > { %899 = vmatpush3.bf16.msra.mxu0 %v978_v17  ;;  %v383_v43 = vrot.slane %v369_v40, %v1194_v42  ;;  %v384_v46 = vcombine.high %v376_v44, %v376_v44  ;;  %v700_v50 = vsel %vm698_vm0, %v883_v49, 0  ;;  %v667_v6 = vld [vmem:[%s281_s30] sm:$0x3] }
  0x2b   : > { %921 = vmatpush3.bf16.msra.mxu1 %v979_v18  ;;  %900 = vmatprep.subr.bf16.mxu0 %v980_v19  ;;  %v672_v8 = vrot.slane %v667_v6, %v671_v5  ;;  %v676_v9 = vrot.slane %v667_v6, %v675_v7 }
  0x2c   : > { %922 = vmatprep.subr.bf16.mxu1 %v981_v20  ;;  %614 = vmatprep.mubr.bf16.mxu0 %v383_v43  ;;  %v385_v45 = vcombine.high %v383_v43, %v383_v43 }
  0x2e   : > { %901 = vmatpush3.bf16.msra.mxu0 %v982_v21  ;;  %654 = vmatprep.mubr.bf16.mxu1 %v385_v45 }
  0x2f   : > { %923 = vmatpush3.bf16.msra.mxu1 %v983_v22  ;;  %902 = vmatprep.subr.bf16.mxu0 %v984_v23 }
  0x30   : > { %924 = vmatprep.subr.bf16.mxu1 %v985_v24 }
  0x32   : > { %903 = vmatpush3.bf16.msra.mxu0 %v986_v25 }
  0x33   : > { %925 = vmatpush3.bf16.msra.mxu1 %v987_v26  ;;  %904 = vmatprep.subr.bf16.mxu0 %v988_v27 }
  0x34   : > { %926 = vmatprep.subr.bf16.mxu1 %v989_v28 }
  0x36   : > { %905 = vmatpush3.bf16.msra.mxu0 %v990_v29 }
  0x37   : > { %927 = vmatpush3.bf16.msra.mxu1 %v991_v30  ;;  %906 = vmatprep.subr.bf16.mxu0 %v992_v31 }
  0x38   : > { %928 = vmatprep.subr.bf16.mxu1 %v993_v32 }
  0x3a   : > { %907 = vmatpush3.bf16.msra.mxu0 %v994_v34 }
  0x3b   : > { %929 = vmatpush3.bf16.msra.mxu1 %v995_v35  ;;  %885 = vmatprep.subr.msk.bf16.mxu0 %vm698_vm0, %v884_v48 }
  0x3d   : > { %615 = vmatmul.mubr.bf16.vlgmr.msra.gmra.mxu0 %v376_v44 }
  0x3e   : > { %655 = vmatmul.mubr.bf16.vlgmr.msra.gmra.mxu1 %v384_v46  ;;  %718 = vmatpush1.bf16.msra.mxu0 %v700_v50 }
  0x3f   : > { %719 = vmatprep.subr.bf16.mxu0 %v1000_v51  ;;  %737 = vmatprep.mubr.bf16.mxu0 %v1028_v53 }
  0x42   : > { %720 = vmatpush1.bf16.msra.mxu0 %v998_v52 }
  0xfd   : > { %v908_v54 = vpop.f32.mrf.mxu0 }
  0xfe   : > { %v930_v55 = vpop.f32.mrf.mxu1 }
  0xff   : > { %v909_v57 = vpop.f32.mrf.mxu0 }
 0x100   : > { %v910_v58 = vadd.f32 %v909_v57, %v908_v54  ;;  %v931_v59 = vpop.f32.mrf.mxu1 }
 0x101   : > { %v911_v60 = vpop.f32.mrf.mxu0  ;;  %v932_v62 = vadd.f32 %v931_v59, %v930_v55 }
 0x102   : > { %v617_v61 = vadd.f32 %v910_v58, %v847_v56  ;;  %v933_v63 = vpop.f32.mrf.mxu1 }
 0x103   : > { %v912_v0 = vpop.f32.mrf.mxu0 }
 0x104   : > { %v657_v1 = vadd.f32 %v932_v62, %v617_v61  ;;  %v934_v2 = vpop.f32.mrf.mxu1 }
 0x106   : > { %1001 = vtanh.f32 %v657_v1 }
 0x113   : > { %v1002_v3 = vpop.eup %1001 }
 0x114   : > { %v663_v4 = vpack.c.bf16 %v1002_v3, %v1002_v3 }
 0x116   : > { %886 = vmatmul.mubr.msk.bf16.vlgmr.msra.gmra.mxu0 %vm694_vm1, %v663_v4 }
 0x1d6   : > { %v739_v10 = vpop.f32.mrf.mxu0 }
 0x1d7   : > { %v740_v11 = vadd.f32 %v739_v10, %v672_v8 }
 0x1d8   : > { %v741_v12 = vpop.f32.mrf.mxu0 }
 0x1d9   : > { %v748_v13 = vmul.f32 0.01, %v740_v11  ;;  %v742_v14 = vadd.f32 %v741_v12, %v676_v9  ;;  %vm746_vm2 = vcmp.ge.f32.partialorder %v740_v11, 0.0 }
 0x1da   : > { %v743_v15 = vpop.f32.mrf.mxu0 }
 0x1db   : > { %vm747_vm3 = vcmp.ge.f32.partialorder %v742_v14, 0.0  ;;  %v749_v16 = vmul.f32 0.01, %v742_v14  ;;  %v750_v18 = vsel %vm746_vm2, %v740_v11, %v748_v13 }
 0x1dc   : > { %v744_v17 = vpop.f32.mrf.mxu0 }
 0x1dd   : > { %v751_v19 = vsel %vm747_vm3, %v742_v14, %v749_v16 }
 0x1de   : > { %v887_v20 = vpack.c.bf16 %v751_v19, %v750_v18 }
 0x1e0   : > { %v763_v21 = vrot.slane %v887_v20, %v1194_v42 }
 0x1e2   : > { %888 = vst.sshfl [vmem:[%s286_s6] sm:$0x5 pattern:$0x73625140] %v763_v21 }
 0x1e3 PF: > { %p12_p9 = scmp.ge.s32.totalorder %s1076_s22, 4   ;;  %s1227_s18 = smov %s1021_s19 }
 0x1e4   : > { %s1228_s19 = smov %s1085_s25  ;;  %s1229_s20 = smov %s1076_s22 }
 0x1e5   :  { %14 = sbr.rel (!%p12_p9) target bundleno = 2 (0x2), region = 116 }

// kernel: tile.18
= control target key start
LH: loop header
LB: loop body
LE: loop exit
PB: predicated region body
PF: predicated region fallthrough
CT: control target
= control target key end

     0   :  { %s22_s0 = inlined_call_operand.vmem [shape: f32[32], index: 0, kind: input, shape index: {}]   ;;  %s23_s1 = inlined_call_operand.vmem [shape: f32[4,32], index: 1, kind: output, shape index: {}]  }
   0x1   :  { %v4_v0 = vld [vmem:[%s22_s0] ss:$0 sm:$0xff] }
   0x2   :  { %5 = vst [vmem:[%s23_s1] sm:$0xf] %v4_v0 }

// kernel: mul.47
= control target key start
LH: loop header
LB: loop body
LE: loop exit
PB: predicated region body
PF: predicated region fallthrough
CT: control target
= control target key end

     0   :  { %vm8_vm0 = vcmask 261120   ;;  %s40_s8 = smov 32   ;;  %s41_s9 = smov 64   ;;  %vm14_vm1 = vcmask 1048320   ;;  %vm20_vm2 = vcmask 785920   ;;  %vm26_vm3 = vcmask 523520   ;;  %s58_s0 = inlined_call_operand.vmem [shape: f32[4,32], index: 0, kind: input, shape index: {}]   ;;  %s59_s1 = inlined_call_operand.vmem [shape: f32[128], index: 1, kind: output, shape index: {}]  }
   0x1   :  { %v5_v0 = vld [vmem:[%s58_s0] sm:$0xf]  ;;  %s39_s0 = smov 96  }
   0x2   :  { %6 = vst [vmem:[#allocation1] sm:$0xf] %v5_v0 }
   0x9   :  { %v11_v1 = vld [vmem:[#allocation1 + $0x3] sm:$0x1]   ;;  %v23_v2 = vld [vmem:[#allocation1 + $0x1] sm:$0x1]   ;;  %v7_v3 = vld [vmem:[#allocation1] sm:$0x1]  }
   0xa   :  { %12 = vrot.lane.b32.xlu0 %v11_v1, %s39_s0  ;;  %24 = vrot.lane.b32.xlu1 %v23_v2, %s40_s8  ;;  %v17_v4 = vld [vmem:[#allocation1 + $0x2] sm:$0x1]   ;;  %9 = vst.msk [vmem:[#allocation0] sm:$0x1] %vm8_vm0, %v7_v3  }
   0xe   :  { %18 = vrot.lane.b32.xlu0 %v17_v4, %s41_s9 }
  0x7c   :  { %v13_v5 = vpop.permute.xlu0 %12   ;;  %v25_v6 = vpop.permute.xlu1 %24  }
  0x7d   :  { %15 = vst.msk [vmem:[#allocation0] sm:$0x1] %vm14_vm1, %v13_v5  }
  0x80   :  { %v19_v7 = vpop.permute.xlu0 %18  }
  0x81   :  { %21 = vst.msk [vmem:[#allocation0] sm:$0x1] %vm20_vm2, %v19_v7  }
  0x82   :  { %27 = vst.msk [vmem:[#allocation0] sm:$0x1] %vm26_vm3, %v25_v6  }
  0x89   :  { %v32_v8 = vld [vmem:[#allocation0] sm:$0x1] }
  0x8a   :  { %35 = vst [vmem:[%s59_s1] sm:$0x1] %v32_v8 }

// kernel: tile.24
= control target key start
LH: loop header
LB: loop body
LE: loop exit
PB: predicated region body
PF: predicated region fallthrough
CT: control target
= control target key end

     0   :  { %vm8_vm0 = vcmask 261120   ;;  %s40_s8 = smov 32   ;;  %s41_s9 = smov 64   ;;  %vm14_vm1 = vcmask 1048320   ;;  %vm20_vm2 = vcmask 785920   ;;  %vm26_vm3 = vcmask 523520   ;;  %s58_s0 = inlined_call_operand.vmem [shape: f32[4,32], index: 0, kind: input, shape index: {}]   ;;  %s59_s1 = inlined_call_operand.vmem [shape: f32[1,128], index: 1, kind: output, shape index: {}]  }
   0x1   :  { %v5_v0 = vld [vmem:[%s58_s0] sm:$0xf]  ;;  %s39_s0 = smov 96  }
   0x2   :  { %6 = vst [vmem:[#allocation1] sm:$0xf] %v5_v0 }
   0x9   :  { %v11_v1 = vld [vmem:[#allocation1 + $0x3] sm:$0x1]   ;;  %v23_v2 = vld [vmem:[#allocation1 + $0x1] sm:$0x1]   ;;  %v7_v3 = vld [vmem:[#allocation1] sm:$0x1]  }
   0xa   :  { %12 = vrot.lane.b32.xlu0 %v11_v1, %s39_s0  ;;  %24 = vrot.lane.b32.xlu1 %v23_v2, %s40_s8  ;;  %v17_v4 = vld [vmem:[#allocation1 + $0x2] sm:$0x1]   ;;  %9 = vst.msk [vmem:[#allocation0] sm:$0x1] %vm8_vm0, %v7_v3  }
   0xe   :  { %18 = vrot.lane.b32.xlu0 %v17_v4, %s41_s9 }
  0x7c   :  { %v13_v5 = vpop.permute.xlu0 %12   ;;  %v25_v6 = vpop.permute.xlu1 %24  }
  0x7d   :  { %15 = vst.msk [vmem:[#allocation0] sm:$0x1] %vm14_vm1, %v13_v5  }
  0x80   :  { %v19_v7 = vpop.permute.xlu0 %18  }
  0x81   :  { %21 = vst.msk [vmem:[#allocation0] sm:$0x1] %vm20_vm2, %v19_v7  }
  0x82   :  { %27 = vst.msk [vmem:[#allocation0] sm:$0x1] %vm26_vm3, %v25_v6  }
  0x89   :  { %v32_v8 = vld [vmem:[#allocation0] sm:$0x1] }
  0x8a   :  { %35 = vst [vmem:[%s59_s1] sm:$0x1] %v32_v8 }

// kernel: tiny_autoencoder_forward.8
= control target key start
LH: loop header
LB: loop body
LE: loop exit
PB: predicated region body
PF: predicated region fallthrough
CT: control target
= control target key end

     0   :  { %s316_s1 = inlined_call_operand.vmem [shape: bf16[128,128], index: 1, kind: input, shape index: {}]   ;;  %s317_s0 = inlined_call_operand.vmem [shape: bf16[32,128], index: 0, kind: input, shape index: {}]   ;;  %s318_s2 = inlined_call_operand.vmem [shape: f32[1,128], index: 2, kind: input, shape index: {}]   ;;  %s319_s3 = inlined_call_operand.vmem [shape: bf16[32,128], index: 3, kind: output, shape index: {}]  }
   0x1   :  { %v247_v0 = vld [vmem:[%s316_s1 + $0x38] sm:$0xff]   ;;  %v248_v1 = vld [vmem:[%s316_s1 + $0x30] sm:$0xff]   ;;  %v249_v2 = vld [vmem:[%s316_s1 + $0x28] sm:$0xff]  }
   0x2   :  { %227 = vmatprep.subr.bf16.mxu0 %v247_v0  ;;  %v250_v3 = vld [vmem:[%s316_s1 + $0x20] sm:$0xff]   ;;  %v251_v5 = vld [vmem:[%s316_s1 + $0x18] sm:$0xff]   ;;  %v252_v6 = vld [vmem:[%s316_s1 + $0x10] sm:$0xff]  }
   0x3   :  { %228 = vmatpush3.bf16.msra.mxu0 %v247_v0  ;;  %v255_v4 = vld [vmem:[%s317_s0] sm:$0xff]   ;;  %v253_v7 = vld [vmem:[%s316_s1 + $0x8] sm:$0xff]  }
   0x4   :  { %229 = vmatprep.subr.bf16.mxu0 %v248_v1  ;;  %243 = vmatprep.mubr.bf16.mxu0 %v255_v4  ;;  %v254_v8 = vld [vmem:[%s316_s1] sm:$0xff]   ;;  %v256_v9 = vld [vmem:[%s317_s0 + $0x8] sm:$0xff]  }
   0x5   :  { %v187_v10 = vld [vmem:[%s318_s2] ss:$0 sm:$0xff] }
   0x7   :  { %230 = vmatpush3.bf16.msra.mxu0 %v248_v1 }
   0x8   :  { %231 = vmatprep.subr.bf16.mxu0 %v249_v2 }
   0xb   :  { %232 = vmatpush3.bf16.msra.mxu0 %v249_v2 }
   0xc   :  { %233 = vmatprep.subr.bf16.mxu0 %v250_v3 }
   0xf   :  { %234 = vmatpush3.bf16.msra.mxu0 %v250_v3 }
  0x10   :  { %235 = vmatprep.subr.bf16.mxu0 %v251_v5 }
  0x13   :  { %236 = vmatpush3.bf16.msra.mxu0 %v251_v5 }
  0x14   :  { %237 = vmatprep.subr.bf16.mxu0 %v252_v6 }
  0x17   :  { %238 = vmatpush3.bf16.msra.mxu0 %v252_v6 }
  0x18   :  { %239 = vmatprep.subr.bf16.mxu0 %v253_v7 }
  0x1b   :  { %240 = vmatpush3.bf16.msra.mxu0 %v253_v7 }
  0x1c   :  { %241 = vmatprep.subr.bf16.mxu0 %v254_v8 }
  0x1f   :  { %242 = vmatpush3.bf16.msra.mxu0 %v254_v8 }
  0x22   :  { %244 = vmatmul.mubr.bf16.vlgmr.msra.gmra.mxu0 %v256_v9 }
  0xe2   :  { %v245_v11 = vpop.f32.mrf.mxu0 }
  0xe3   :  { %v145_v12 = vadd.f32 %v245_v11, %v187_v10 }
  0xe4   :  { %v136_v13 = vpop.f32.mrf.mxu0 }
  0xe5   :  { %v137_v14 = vadd.f32 %v187_v10, %v136_v13  ;;  %v157_v16 = vmul.f32 0.01, %v145_v12  ;;  %vm153_vm0 = vcmp.ge.f32.partialorder %v145_v12, 0.0 }
  0xe6   :  { %v246_v15 = vpop.f32.mrf.mxu0 }
  0xe7   :  { %v148_v17 = vadd.f32 %v246_v15, %v187_v10  ;;  %v155_v19 = vmul.f32 0.01, %v137_v14  ;;  %vm151_vm2 = vcmp.ge.f32.partialorder %v137_v14, 0.0  ;;  %v161_v22 = vsel %vm153_vm0, %v145_v12, %v157_v16 }
  0xe8   :  { %v139_v18 = vpop.f32.mrf.mxu0 }
  0xe9   :  { %vm154_vm1 = vcmp.ge.f32.partialorder %v148_v17, 0.0  ;;  %v158_v20 = vmul.f32 0.01, %v148_v17  ;;  %v140_v21 = vadd.f32 %v187_v10, %v139_v18  ;;  %v159_v26 = vsel %vm151_vm2, %v137_v14, %v155_v19 }
  0xeb   :  { %v162_v23 = vsel %vm154_vm1, %v148_v17, %v158_v20  ;;  %vm152_vm3 = vcmp.ge.f32.partialorder %v140_v21, 0.0  ;;  %v156_v24 = vmul.f32 0.01, %v140_v21 }
  0xec   :  { %v214_v25 = vpack.c.bf16 %v162_v23, %v161_v22 }
  0xed   :  { %v160_v27 = vsel %vm152_vm3, %v140_v21, %v156_v24 }
  0xee   :  { %216 = vst [vmem:[%s319_s3 + $0x8] sm:$0xff] %v214_v25   ;;  %v209_v28 = vpack.c.bf16 %v160_v27, %v159_v26 }
  0xf0   :  { %210 = vst [vmem:[%s319_s3] sm:$0xff] %v209_v28  }

// kernel: tiny_autoencoder_forward.9
= control target key start
LH: loop header
LB: loop body
LE: loop exit
PB: predicated region body
PF: predicated region fallthrough
CT: control target
= control target key end

     0   :  { %vm343_vm0 = vcmask 31744   ;;  %s678_s1 = inlined_call_operand.vmem [shape: bf16[128,4], index: 1, kind: input, shape index: {}]   ;;  %s679_s0 = inlined_call_operand.vmem [shape: bf16[128,128], index: 0, kind: input, shape index: {}]   ;;  %s680_s2 = inlined_call_operand.vmem [shape: f32[1,4], index: 2, kind: input, shape index: {}]   ;;  %s681_s3 = inlined_call_operand.vmem [shape: f32[128,4], index: 3, kind: output, shape index: {}]  }
   0x1   :  { %v445_v0 = vld [vmem:[%s678_s1 + $0x38] sm:$0xff]   ;;  %v446_v1 = vld [vmem:[%s678_s1 + $0x30] sm:$0xff]   ;;  %v447_v2 = vld [vmem:[%s678_s1 + $0x28] sm:$0xff]  }
   0x2   :  { %397 = vmatprep.subr.bf16.mxu0 %v445_v0  ;;  %429 = vmatprep.subr.bf16.mxu1 %v445_v0  ;;  %v448_v3 = vld [vmem:[%s678_s1 + $0x20] sm:$0xff]   ;;  %v449_v6 = vld [vmem:[%s678_s1 + $0x18] sm:$0xff]   ;;  %v450_v7 = vld [vmem:[%s678_s1 + $0x10] sm:$0xff]  }
   0x3   :  { %398 = vmatpush3.bf16.msra.mxu0 %v445_v0  ;;  %437 = vmatpush3.bf16.msra.mxu1 %v445_v0  ;;  %v453_v4 = vld [vmem:[%s679_s0] sm:$0xff]   ;;  %v451_v8 = vld [vmem:[%s678_s1 + $0x8] sm:$0xff]   ;;  %v457_v12 = vld [vmem:[%s679_s0 + $0x10] sm:$0xff]  }
   0x4   :  { %399 = vmatprep.subr.bf16.mxu0 %v446_v1  ;;  %430 = vmatprep.subr.bf16.mxu1 %v446_v1  ;;  %v454_v5 = vld [vmem:[%s679_s0 + $0x20] sm:$0xff]   ;;  %v455_v10 = vld [vmem:[%s679_s0 + $0x8] sm:$0xff]   ;;  %v458_v13 = vld [vmem:[%s679_s0 + $0x30] sm:$0xff]  }
   0x5   :  { %413 = vmatprep.mubr.bf16.mxu0 %v453_v4  ;;  %421 = vmatprep.mubr.bf16.mxu1 %v454_v5  ;;  %v452_v9 = vld [vmem:[%s678_s1] sm:$0xff]   ;;  %v456_v11 = vld [vmem:[%s679_s0 + $0x28] sm:$0xff]   ;;  %v459_v14 = vld [vmem:[%s679_s0 + $0x18] sm:$0xff]  }
   0x6   :  { %v460_v15 = vld [vmem:[%s679_s0 + $0x38] sm:$0xff]   ;;  %v596_v16 = vld [vmem:[%s680_s2] ss:$0 sm:$0xff] }
   0x7   :  { %400 = vmatpush3.bf16.msra.mxu0 %v446_v1  ;;  %438 = vmatpush3.bf16.msra.mxu1 %v446_v1 }
   0x8   :  { %401 = vmatprep.subr.bf16.mxu0 %v447_v2  ;;  %431 = vmatprep.subr.bf16.mxu1 %v447_v2 }
   0xb   :  { %402 = vmatpush3.bf16.msra.mxu0 %v447_v2  ;;  %439 = vmatpush3.bf16.msra.mxu1 %v447_v2 }
   0xc   :  { %403 = vmatprep.subr.bf16.mxu0 %v448_v3  ;;  %432 = vmatprep.subr.bf16.mxu1 %v448_v3 }
   0xf   :  { %404 = vmatpush3.bf16.msra.mxu0 %v448_v3  ;;  %440 = vmatpush3.bf16.msra.mxu1 %v448_v3 }
  0x10   :  { %405 = vmatprep.subr.bf16.mxu0 %v449_v6  ;;  %433 = vmatprep.subr.bf16.mxu1 %v449_v6 }
  0x13   :  { %406 = vmatpush3.bf16.msra.mxu0 %v449_v6  ;;  %441 = vmatpush3.bf16.msra.mxu1 %v449_v6 }
  0x14   :  { %407 = vmatprep.subr.bf16.mxu0 %v450_v7  ;;  %434 = vmatprep.subr.bf16.mxu1 %v450_v7 }
  0x17   :  { %408 = vmatpush3.bf16.msra.mxu0 %v450_v7  ;;  %442 = vmatpush3.bf16.msra.mxu1 %v450_v7 }
  0x18   :  { %409 = vmatprep.subr.bf16.mxu0 %v451_v8  ;;  %435 = vmatprep.subr.bf16.mxu1 %v451_v8 }
  0x1b   :  { %410 = vmatpush3.bf16.msra.mxu0 %v451_v8  ;;  %443 = vmatpush3.bf16.msra.mxu1 %v451_v8 }
  0x1c   :  { %411 = vmatprep.subr.bf16.mxu0 %v452_v9  ;;  %436 = vmatprep.subr.bf16.mxu1 %v452_v9 }
  0x1f   :  { %412 = vmatpush3.bf16.msra.mxu0 %v452_v9  ;;  %444 = vmatpush3.bf16.msra.mxu1 %v452_v9 }
  0x22   :  { %414 = vmatmul.mubr.bf16.vlgmr.msra.gmra.mxu0 %v455_v10  ;;  %422 = vmatmul.mubr.bf16.vlgmr.msra.gmra.mxu1 %v456_v11 }
  0x23   :  { %417 = vmatprep.mubr.bf16.mxu0 %v457_v12  ;;  %425 = vmatprep.mubr.bf16.mxu1 %v458_v13 }
  0x2a   :  { %418 = vmatmul.mubr.bf16.gmra.mxu0 %v459_v14  ;;  %426 = vmatmul.mubr.bf16.gmra.mxu1 %v460_v15 }
  0xe2   :  { %v415_v17 = vpop.f32.mrf.mxu0  ;;  %v423_v18 = vpop.f32.mrf.mxu1 }
  0xe3   :  { %v193_v19 = vadd.f32 %v415_v17, %v596_v16  ;;  %v225_v20 = vadd.f32 %v423_v18, %v596_v16 }
  0xe4   :  { %v184_v21 = vpop.f32.mrf.mxu0  ;;  %v216_v22 = vpop.f32.mrf.mxu1 }
  0xe5   :  { %v249_v23 = vsub.f32 0.0, %v193_v19  ;;  %v257_v24 = vsub.f32 0.0, %v225_v20  ;;  %v185_v25 = vadd.f32 %v596_v16, %v184_v21  ;;  %v217_v26 = vadd.f32 %v596_v16, %v216_v22 }
  0xe6   :  { %v416_v27 = vpop.f32.mrf.mxu0  ;;  %v424_v28 = vpop.f32.mrf.mxu1 }
  0xe7   :  { %v267_v29 = vmul.f32 1.442695, %v249_v23  ;;  %v283_v30 = vmul.f32 1.442695, %v257_v24  ;;  %v247_v31 = vsub.f32 0.0, %v185_v25  ;;  %v255_v32 = vsub.f32 0.0, %v217_v26 }
  0xe8   :  { %v196_v33 = vadd.f32 %v416_v27, %v596_v16  ;;  %v228_v34 = vadd.f32 %v424_v28, %v596_v16  ;;  %v187_v35 = vpop.f32.mrf.mxu0  ;;  %v219_v36 = vpop.f32.mrf.mxu1 }
  0xe9   :  { %461 = vpow2.f32 %v267_v29  ;;  %v263_v37 = vmul.f32 1.442695, %v247_v31  ;;  %v279_v38 = vmul.f32 1.442695, %v255_v32  ;;  %v188_v39 = vadd.f32 %v596_v16, %v187_v35 }
  0xea   :  { %463 = vpow2.f32 %v283_v30  ;;  %v250_v40 = vsub.f32 0.0, %v196_v33  ;;  %v258_v41 = vsub.f32 0.0, %v228_v34  ;;  %v220_v42 = vadd.f32 %v596_v16, %v219_v36  ;;  %v419_v43 = vpop.f32.mrf.mxu0  ;;  %v427_v44 = vpop.f32.mrf.mxu1 }
  0xeb   :  { %465 = vpow2.f32 %v263_v37  ;;  %v248_v45 = vsub.f32 0.0, %v188_v39  ;;  %v209_v46 = vadd.f32 %v419_v43, %v596_v16  ;;  %v241_v47 = vadd.f32 %v427_v44, %v596_v16 }
  0xec   :  { %467 = vpow2.f32 %v279_v38  ;;  %v269_v48 = vmul.f32 1.442695, %v250_v40  ;;  %v285_v49 = vmul.f32 1.442695, %v258_v41  ;;  %v256_v50 = vsub.f32 0.0, %v220_v42  ;;  %v200_v51 = vpop.f32.mrf.mxu0  ;;  %v232_v52 = vpop.f32.mrf.mxu1 }
  0xed   :  { %v265_v53 = vmul.f32 1.442695, %v248_v45  ;;  %v253_v54 = vsub.f32 0.0, %v209_v46  ;;  %v261_v55 = vsub.f32 0.0, %v241_v47  ;;  %v201_v56 = vadd.f32 %v596_v16, %v200_v51 }
  0xee   :  { %469 = vpow2.f32 %v269_v48  ;;  %v281_v57 = vmul.f32 1.442695, %v256_v50  ;;  %v233_v58 = vadd.f32 %v596_v16, %v232_v52  ;;  %v420_v59 = vpop.f32.mrf.mxu0  ;;  %v428_v60 = vpop.f32.mrf.mxu1 }
  0xef   :  { %471 = vpow2.f32 %v285_v49  ;;  %v275_v61 = vmul.f32 1.442695, %v253_v54  ;;  %v291_v62 = vmul.f32 1.442695, %v261_v55  ;;  %v251_v63 = vsub.f32 0.0, %v201_v56 }
  0xf0   :  { %473 = vpow2.f32 %v265_v53  ;;  %v259_v0 = vsub.f32 0.0, %v233_v58  ;;  %v212_v1 = vadd.f32 %v420_v59, %v596_v16  ;;  %v244_v2 = vadd.f32 %v428_v60, %v596_v16  ;;  %v203_v3 = vpop.f32.mrf.mxu0  ;;  %v235_v4 = vpop.f32.mrf.mxu1 }
  0xf1   :  { %475 = vpow2.f32 %v281_v57  ;;  %v271_v5 = vmul.f32 1.442695, %v251_v63  ;;  %v204_v6 = vadd.f32 %v596_v16, %v203_v3  ;;  %v236_v7 = vadd.f32 %v596_v16, %v235_v4 }
  0xf2   :  { %477 = vpow2.f32 %v275_v61  ;;  %v287_v8 = vmul.f32 1.442695, %v259_v0  ;;  %v254_v9 = vsub.f32 0.0, %v212_v1  ;;  %v262_v10 = vsub.f32 0.0, %v244_v2 }
  0xf3   :  { %479 = vpow2.f32 %v291_v62  ;;  %v252_v11 = vsub.f32 0.0, %v204_v6  ;;  %v260_v15 = vsub.f32 0.0, %v236_v7 }
  0xf4   :  { %481 = vpow2.f32 %v271_v5  ;;  %v277_v12 = vmul.f32 1.442695, %v254_v9  ;;  %v293_v13 = vmul.f32 1.442695, %v262_v10 }
  0xf5   :  { %483 = vpow2.f32 %v287_v8  ;;  %v273_v14 = vmul.f32 1.442695, %v252_v11  ;;  %v289_v23 = vmul.f32 1.442695, %v260_v15 }
  0xf6   :  { %v462_v17 = vpop.eup %461  ;;  %485 = vpow2.f32 %v277_v12 }
  0xf7   :  { %v464_v18 = vpop.eup %463  ;;  %v297_v19 = vadd.f32 1.0, %v462_v17  ;;  %487 = vpow2.f32 %v293_v13 }
  0xf8   :  { %v466_v20 = vpop.eup %465  ;;  %v305_v21 = vadd.f32 1.0, %v464_v18  ;;  %489 = vpow2.f32 %v273_v14 }
  0xf9   :  { %v468_v16 = vpop.eup %467  ;;  %491 = vrcp.f32 %v297_v19  ;;  %v295_v22 = vadd.f32 1.0, %v466_v20 }
  0xfa   :  { %493 = vrcp.f32 %v305_v21  ;;  %v303_v24 = vadd.f32 1.0, %v468_v16 }
  0xfb   :  { %v470_v25 = vpop.eup %469  ;;  %495 = vrcp.f32 %v295_v22 }
  0xfc   :  { %v472_v26 = vpop.eup %471  ;;  %497 = vrcp.f32 %v303_v24  ;;  %v298_v27 = vadd.f32 1.0, %v470_v25 }
  0xfd   :  { %v474_v28 = vpop.eup %473  ;;  %v306_v29 = vadd.f32 1.0, %v472_v26  ;;  %499 = vpow2.f32 %v289_v23 }
  0xfe   :  { %v476_v30 = vpop.eup %475  ;;  %501 = vrcp.f32 %v298_v27  ;;  %v296_v31 = vadd.f32 1.0, %v474_v28 }
  0xff   :  { %v478_v32 = vpop.eup %477  ;;  %503 = vrcp.f32 %v306_v29  ;;  %v304_v33 = vadd.f32 1.0, %v476_v30 }
 0x100   :  { %v480_v34 = vpop.eup %479  ;;  %505 = vrcp.f32 %v296_v31  ;;  %v301_v35 = vadd.f32 1.0, %v478_v32 }
 0x101   :  { %v482_v36 = vpop.eup %481  ;;  %507 = vrcp.f32 %v304_v33  ;;  %v309_v37 = vadd.f32 1.0, %v480_v34 }
 0x102   :  { %v484_v38 = vpop.eup %483  ;;  %509 = vrcp.f32 %v301_v35  ;;  %v299_v39 = vadd.f32 1.0, %v482_v36 }
 0x103   :  { %v486_v40 = vpop.eup %485  ;;  %511 = vrcp.f32 %v309_v37  ;;  %v307_v41 = vadd.f32 1.0, %v484_v38 }
 0x104   :  { %v488_v42 = vpop.eup %487  ;;  %513 = vrcp.f32 %v299_v39  ;;  %v302_v43 = vadd.f32 1.0, %v486_v40 }
 0x105   :  { %v490_v44 = vpop.eup %489  ;;  %515 = vrcp.f32 %v307_v41  ;;  %v310_v45 = vadd.f32 1.0, %v488_v42 }
 0x106   :  { %v492_v46 = vpop.eup %491  ;;  %517 = vrcp.f32 %v302_v43  ;;  %v300_v47 = vadd.f32 1.0, %v490_v44 }
 0x107   :  { %v494_v48 = vpop.eup %493  ;;  %346 = vst.msk [vmem:[%s681_s3 + $0x10] sm:$0xff] %vm343_vm0, %v492_v46  ;;  %519 = vrcp.f32 %v310_v45 }
 0x108   :  { %v496_v49 = vpop.eup %495  ;;  %354 = vst.msk [vmem:[%s681_s3 + $0x50] sm:$0xff] %vm343_vm0, %v494_v48  ;;  %521 = vrcp.f32 %v300_v47 }
 0x109   :  { %v498_v50 = vpop.eup %497  ;;  %344 = vst.msk [vmem:[%s681_s3] sm:$0xff] %vm343_vm0, %v496_v49 }
 0x10a   :  { %v500_v51 = vpop.eup %499  ;;  %352 = vst.msk [vmem:[%s681_s3 + $0x40] sm:$0xff] %vm343_vm0, %v498_v50 }
 0x10b   :  { %v502_v52 = vpop.eup %501  ;;  %v308_v53 = vadd.f32 1.0, %v500_v51 }
 0x10c   :  { %v504_v54 = vpop.eup %503  ;;  %347 = vst.msk [vmem:[%s681_s3 + $0x18] sm:$0xff] %vm343_vm0, %v502_v52 }
 0x10d   :  { %v506_v55 = vpop.eup %505  ;;  %355 = vst.msk [vmem:[%s681_s3 + $0x58] sm:$0xff] %vm343_vm0, %v504_v54  ;;  %523 = vrcp.f32 %v308_v53 }
 0x10e   :  { %v508_v56 = vpop.eup %507  ;;  %345 = vst.msk [vmem:[%s681_s3 + $0x8] sm:$0xff] %vm343_vm0, %v506_v55 }
 0x10f   :  { %v510_v57 = vpop.eup %509  ;;  %353 = vst.msk [vmem:[%s681_s3 + $0x48] sm:$0xff] %vm343_vm0, %v508_v56 }
 0x110   :  { %v512_v58 = vpop.eup %511  ;;  %350 = vst.msk [vmem:[%s681_s3 + $0x30] sm:$0xff] %vm343_vm0, %v510_v57 }
 0x111   :  { %v514_v59 = vpop.eup %513  ;;  %358 = vst.msk [vmem:[%s681_s3 + $0x70] sm:$0xff] %vm343_vm0, %v512_v58 }
 0x112   :  { %v516_v60 = vpop.eup %515  ;;  %348 = vst.msk [vmem:[%s681_s3 + $0x20] sm:$0xff] %vm343_vm0, %v514_v59 }
 0x113   :  { %v518_v61 = vpop.eup %517  ;;  %356 = vst.msk [vmem:[%s681_s3 + $0x60] sm:$0xff] %vm343_vm0, %v516_v60 }
 0x114   :  { %v520_v62 = vpop.eup %519  ;;  %351 = vst.msk [vmem:[%s681_s3 + $0x38] sm:$0xff] %vm343_vm0, %v518_v61 }
 0x115   :  { %v522_v63 = vpop.eup %521  ;;  %359 = vst.msk [vmem:[%s681_s3 + $0x78] sm:$0xff] %vm343_vm0, %v520_v62 }
 0x116   :  { %349 = vst.msk [vmem:[%s681_s3 + $0x28] sm:$0xff] %vm343_vm0, %v522_v63 }
 0x11a   :  { %v524_v0 = vpop.eup %523 }
 0x11b   :  { %357 = vst.msk [vmem:[%s681_s3 + $0x68] sm:$0xff] %vm343_vm0, %v524_v0 }

</bundles_post_ra>
